<compile_context>
chip_gen: v7x
topology: tpu7x:2x2x1
jax: 0.10.0
libtpu: 0.0.40
codegen_flags: <defaults>
</compile_context>

<pallas_src>
import functools
import math

import jax
import jax.numpy as jnp
from jax import lax
from jax.experimental import pallas as pl
from jax.experimental.pallas import tpu as pltpu


def _belief_kernel(x_ref, u_ref, o_ref, *, num_class):
    # x_ref: (block_r, kP)     packed input rows
    # u_ref: (1, kPC)          normalized beta flattened to output lane order
    # o_ref: (block_r, kPC)    packed output rows
    C = num_class
    kP = x_ref.shape[-1]
    kPC = o_ref.shape[-1]

    # Constant 0/1 expansion matrix E[q, m] = 1 iff m // C == q, built from
    # iotas (a few % of per-step VPU work; VALU has slack vs. MXU/HBM).
    row = lax.broadcasted_iota(jnp.int32, (kP, kPC), 0)
    col = lax.broadcasted_iota(jnp.int32, (kP, kPC), 1)
    lo_b = row * C
    e = jnp.where((col >= lo_b) & (col < lo_b + C), 1.0, 0.0).astype(jnp.bfloat16)

    x = x_ref[...]
    if x.dtype == jnp.bfloat16:
        # bf16 feeds the MXU directly: one pass, exact (E is 0/1, f32 acc).
        x_exp = jnp.dot(x, e, preferred_element_type=jnp.float32)
    else:
        # Exact-enough 3-limb bf16 decomposition of f32; each DEFAULT bf16 dot
        # is a single MXU pass and reproduces its limb exactly through E.
        xf = x.astype(jnp.float32)
        hi = xf.astype(jnp.bfloat16)
        r1 = xf - hi.astype(jnp.float32)
        mid = r1.astype(jnp.bfloat16)
        lo = (r1 - mid.astype(jnp.float32)).astype(jnp.bfloat16)
        x_exp = (jnp.dot(hi, e, preferred_element_type=jnp.float32)
                 + jnp.dot(mid, e, preferred_element_type=jnp.float32)
                 + jnp.dot(lo, e, preferred_element_type=jnp.float32))
        # NOTE: non-finite inputs contaminate the whole packed row (0*Inf=NaN
        # in the expansion sum) unlike the reference einsum.

    # Exact f32 VPU multiply by normalized beta (broadcast over rows).
    o_ref[...] = (x_exp * u_ref[...]).astype(o_ref.dtype)


def _pick_pack_factor(rows, P, C):
    """How many consecutive flattened rows to pack into one lane-row.

    Preference (lexicographic):
      1. output lane density   (k*P*C) % 128 == 0   -> unmasked stores
      2. no row padding         rows % k == 0       -> no output-sized slice
      3. input lane density    (k*P) % 128 == 0
      4. small k (small expansion matrix / MXU contraction)
    subject to k*P <= 256 (one MXU pass per limb per 256-wide output tile).
    k only affects layout, never correctness."""
    best_k, best_score = 1, None
    for k in range(1, 129):
        if k > 1 and k * P > 256:
            break
        score = ((k * P * C) % 128 == 0, rows % k == 0, (k * P) % 128 == 0, -k)
        if best_score is None or score > best_score:
            best_k, best_score = k, score
    return best_k


def _ceil(a, b):
    return -(-a // b)


def belief_layer(inputs, weight, *, target_block_bytes=8 * 1024 * 1024,
                 min_grid_steps=8):
    """out[..., p, c] = inputs[..., p] * u[c, p],  u = weight^2 / sum_c weight^2."""
    C, P = weight.shape
    orig_shape = inputs.shape
    assert orig_shape[-1] == P, "last dim of inputs must be n_prototypes"
    rows = math.prod(orig_shape[:-1])
    out_dtype = jnp.promote_types(inputs.dtype, weight.dtype)

    # Tiny (C, P) preprocessing of the learned weight (plain JAX; negligible).
    b2 = jnp.square(weight.astype(jnp.float32))
    u = b2 / jnp.sum(b2, axis=0, keepdims=True)                     # (C, P)

    k = _pick_pack_factor(rows, P, C)
    kP, kPC = k * P, k * P * C
    packed_rows = pl.cdiv(rows, k)
    rows_padded = packed_rows * k

    # Free, contiguous row-major reshape: k rows packed per lane-row.
    x2d = inputs.reshape(rows, P)
    if rows_padded != rows:
        # Input-only zero pad (~1/C of total traffic); better than losing
        # output lane density.
        x2d = jnp.pad(x2d, ((0, rows_padded - rows), (0, 0)))
    x2d = x2d.reshape(packed_rows, kP)

    # u flattened to output lane order (p-major, c-minor), tiled k times.
    u_flat = jnp.tile(jnp.transpose(u).reshape(1, P * C), (1, k))   # (1, kPC) f32

    # Row-block: ~target_block_bytes of output per step (multiple of 8
    # sublanes), capped so >= min_grid_steps steps remain for multi-core
    # sharding; ragged last block via cdiv grid instead of padding.
    in_itemsize = jnp.dtype(inputs.dtype).itemsize
    out_itemsize = jnp.dtype(out_dtype).itemsize
    out_row_bytes = kPC * out_itemsize
    block_r = max(8, (target_block_bytes // out_row_bytes) // 8 * 8)
    steps_cap = max(8, _ceil(_ceil(packed_rows, min_grid_steps), 8) * 8)
    block_r = min(block_r, steps_cap)
    if block_r >= packed_rows:
        block_r = packed_rows
    grid = (pl.cdiv(packed_rows, block_r),)

    # VMEM budget derived from actual footprint (double-buffered I/O + u,
    # in-kernel bf16 limbs, expansion matrix + iota temps, f32 expanded block).
    in_block_bytes = block_r * kP * in_itemsize
    out_block_bytes = block_r * kPC * out_itemsize
    u_bytes = kPC * 4
    tmp_bytes = 4 * block_r * kP * 4 + block_r * kPC * 4 + kP * kPC * 12
    vmem_needed = 2 * (in_block_bytes + out_block_bytes + u_bytes) + tmp_bytes
    vmem_limit = int(min(max(vmem_needed * 5 // 4 + (2 << 20), 16 << 20), 64 << 20))

    n_limbs = 1 if inputs.dtype == jnp.bfloat16 else 3
    cost = pl.CostEstimate(
        flops=int(2 * rows_padded * P * kPC * n_limbs + rows_padded * P * C),
        transcendentals=0,
        bytes_accessed=int(rows_padded * P * in_itemsize
                           + rows_padded * P * C * out_itemsize + kPC * 4),
    )

    kernel = functools.partial(_belief_kernel, num_class=C)
    out2d = pl.pallas_call(
        kernel,
        out_shape=jax.ShapeDtypeStruct((packed_rows, kPC), out_dtype),
        grid=grid,
        in_specs=[
            pl.BlockSpec((block_r, kP), lambda i: (i, 0)),
            pl.BlockSpec((1, kPC), lambda i: (0, 0)),   # resident constant (u)
        ],
        out_specs=pl.BlockSpec((block_r, kPC), lambda i: (i, 0)),
        compiler_params=pltpu.CompilerParams(
            dimension_semantics=("parallel",),
            vmem_limit_bytes=vmem_limit,
        ),
        cost_estimate=cost,
    )(x2d, u_flat)

    # Free reshape back: (rows_padded/k, kPC) has exactly the row-major layout
    # of (rows_padded, P, C).
    out = out2d.reshape(rows_padded, P, C)
    if rows_padded != rows:
        # TODO(synk): fold remainder rows into the kernel's ragged last block
        # instead of this output-sized slice copy.
        out = out[:rows]
    return out.reshape(*orig_shape[:-1], P, C)


if __name__ == "__main__":
    key = jax.random.PRNGKey(0)
    k_x, k_w = jax.random.split(key)

    # Shapes implied by the module: inputs (batch, ch, spatial, n_prototypes);
    # weight = Linear(n_prototypes -> num_class).weight has shape (num_class, n_prototypes).
    B, CH, S, P = 2, 4, 16, 16
    C = 8
    x = jax.random.uniform(k_x, (B, CH, S, P), dtype=jnp.float32, minval=0.1, maxval=1.0)
    w = jax.random.normal(k_w, (C, P), dtype=jnp.float32)

    out = jax.block_until_ready(belief_layer(x, w))

    # Pure-JAX reference mirroring the PyTorch forward exactly.
    b2 = jnp.square(w)
    u_ref = b2 / jnp.sum(b2, axis=0, keepdims=True)
    ref = jnp.einsum('cp,bhsp->bhspc', u_ref, x)

    assert out.shape == (B, CH, S, P, C)
    assert out.dtype == ref.dtype
    assert jnp.allclose(out, ref, atol=1e-6, rtol=1e-6), "mismatch vs reference"
    print("KERNEL_OK")
</pallas_src>

<mosaic_0001>
module attributes {stable_mosaic.version = 11 : i64} {
  func.func @_belief_kernel(%arg0: i32, %arg1: memref<8x128xf32, #tpu.memory_space<vmem>>, %arg2: memref<1x1024xf32, #tpu.memory_space<vmem>>, %arg3: memref<8x1024xf32, #tpu.memory_space<vmem>>) attributes {dimension_semantics = [#tpu.dimension_semantics<parallel>], iteration_bounds = array<i64: 2>, scalar_prefetch = 0 : i64, scratch_operands = 0 : i64, tpu.core_type = #tpu.core_type<tc>, window_params = [{transform_indices = @transform_0, window_bounds = array<i64: 8, 128>}, {pipeline_mode = #tpu.pipeline_mode<synchronous>, transform_indices = @transform_1, window_bounds = array<i64: 1, 1024>}, {transform_indices = @transform_2, window_bounds = array<i64: 8, 1024>}]} {
    %0 = tpu.iota {dimensions = array<i32: 0>} : vector<128x1024xi32>
    %1 = tpu.iota {dimensions = array<i32: 1>} : vector<128x1024xi32>
    %c8_i32 = arith.constant 8 : i32
    %2 = vector.broadcast %c8_i32 : i32 to vector<128x1024xi32>
    %3 = arith.muli %0, %2 : vector<128x1024xi32>
    %4 = arith.cmpi sge, %1, %3 : vector<128x1024xi32>
    %c8_i32_0 = arith.constant 8 : i32
    %5 = vector.broadcast %c8_i32_0 : i32 to vector<128x1024xi32>
    %6 = arith.addi %3, %5 : vector<128x1024xi32>
    %7 = arith.cmpi slt, %1, %6 : vector<128x1024xi32>
    %8 = arith.andi %4, %7 : vector<128x1024xi1>
    %cst = arith.constant 1.000000e+00 : f32
    %cst_1 = arith.constant 0.000000e+00 : f32
    %9 = vector.broadcast %cst : f32 to vector<128x1024xf32>
    %10 = vector.broadcast %cst_1 : f32 to vector<128x1024xf32>
    %11 = arith.select %8, %9, %10 : vector<128x1024xi1>, vector<128x1024xf32>
    %12 = arith.truncf %11 : vector<128x1024xf32> to vector<128x1024xbf16>
    %c0 = arith.constant 0 : index
    %c0_2 = arith.constant 0 : index
    %13 = vector.load %arg1[%c0, %c0_2] : memref<8x128xf32, #tpu.memory_space<vmem>>, vector<8x128xf32>
    %14 = arith.truncf %13 : vector<8x128xf32> to vector<8x128xbf16>
    %15 = arith.extf %14 : vector<8x128xbf16> to vector<8x128xf32>
    %16 = arith.subf %13, %15 : vector<8x128xf32>
    %17 = arith.truncf %16 : vector<8x128xf32> to vector<8x128xbf16>
    %18 = arith.extf %17 : vector<8x128xbf16> to vector<8x128xf32>
    %19 = arith.subf %16, %18 : vector<8x128xf32>
    %20 = arith.truncf %19 : vector<8x128xf32> to vector<8x128xbf16>
    %cst_3 = arith.constant dense<0.000000e+00> : vector<8x1024xf32>
    %21 = tpu.matmul %14, %12, %cst_3 {dimension_numbers = #tpu.dot_dimension_numbers<[1], [0], [0], [1], [0, 0, 1, 1], [], []>} : vector<8x128xbf16>, vector<128x1024xbf16>, vector<8x1024xf32> -> vector<8x1024xf32>
    %cst_4 = arith.constant dense<0.000000e+00> : vector<8x1024xf32>
    %22 = tpu.matmul %17, %12, %cst_4 {dimension_numbers = #tpu.dot_dimension_numbers<[1], [0], [0], [1], [0, 0, 1, 1], [], []>} : vector<8x128xbf16>, vector<128x1024xbf16>, vector<8x1024xf32> -> vector<8x1024xf32>
    %23 = arith.addf %21, %22 : vector<8x1024xf32>
    %cst_5 = arith.constant dense<0.000000e+00> : vector<8x1024xf32>
    %24 = tpu.matmul %20, %12, %cst_5 {dimension_numbers = #tpu.dot_dimension_numbers<[1], [0], [0], [1], [0, 0, 1, 1], [], []>} : vector<8x128xbf16>, vector<128x1024xbf16>, vector<8x1024xf32> -> vector<8x1024xf32>
    %25 = arith.addf %23, %24 : vector<8x1024xf32>
    %c0_6 = arith.constant 0 : index
    %c0_7 = arith.constant 0 : index
    %26 = vector.load %arg2[%c0_6, %c0_7] : memref<1x1024xf32, #tpu.memory_space<vmem>>, vector<1x1024xf32>
    %27 = vector.broadcast %26 : vector<1x1024xf32> to vector<8x1024xf32>
    %28 = arith.mulf %25, %27 : vector<8x1024xf32>
    %c0_8 = arith.constant 0 : index
    %c0_9 = arith.constant 0 : index
    %29 = vector.load %arg3[%c0_8, %c0_9] : memref<8x1024xf32, #tpu.memory_space<vmem>>, vector<8x1024xf32>
    tpu.vector_store %arg3[%c0_8, %c0_9], %28 {strides = array<i32>} : memref<8x1024xf32, #tpu.memory_space<vmem>>, vector<8x1024xf32>,
    return
  }
  func.func @transform_0(%arg0: i32) -> (i32, i32) {
    %c0_i32 = arith.constant 0 : i32
    %c0_i32_0 = arith.constant 0 : i32
    return %arg0, %c0_i32 : i32, i32
  }
  func.func @transform_1(%arg0: i32) -> (i32, i32) {
    %c0_i32 = arith.constant 0 : i32
    %c0_i32_0 = arith.constant 0 : i32
    %c0_i32_1 = arith.constant 0 : i32
    return %c0_i32, %c0_i32_0 : i32, i32
  }
  func.func @transform_2(%arg0: i32) -> (i32, i32) {
    %c0_i32 = arith.constant 0 : i32
    %c0_i32_0 = arith.constant 0 : i32
    return %arg0, %c0_i32 : i32, i32
  }
}

</mosaic_0001>

<bundles_post_ra>
// kernel: tpu_custom_call.1
= control target key start
LH: loop header
LB: loop body
LE: loop exit
PB: predicated region body
PF: predicated region fallthrough
CT: control target
= control target key end

     0   :  { %7 = vsyncpa [#allocation3], 0  ;;  %s4390_s0 = inlined_call_operand.hbm [shape: f32[16,128], index: 0, kind: input, shape index: {}]   ;;  %s4391_s1 = inlined_call_operand.hbm [shape: f32[1,1024], index: 1, kind: input, shape index: {}]   ;;  %s4392_s2 = inlined_call_operand.hbm [shape: f32[16,1024], index: 2, kind: output, shape index: {}]  }
   0x1   :  { %9 = vsyncpa [#allocation3 + $0x1], 0 }
   0x2   :  { %10 = vsyncpa [#allocation6], 0 }
   0x3   :  { %11 = vsyncpa [#allocation4], 0 }
   0x4   :  { %13 = vsyncpa [#allocation4 + $0x1], 0  ;;  %s2109_s9 = smov 0   ;;  %s2111_s10 = smov 0  }
   0x5   :  { %s2113_s11 = smov 0   ;;  %s2115_s12 = smov 0  }
   0x6 LB: > { %s2130_s13 = sadd.s32 4294967295, %s2087_s12   ;;  %s1468_s14 = sadd.s32 4294967294, %s2087_s12   ;;  %s2087_s12 = sphi %s2115_s12, %s5013_s12   ;;  %s2083_s11 = sphi %s2113_s11, %s5012_s11   ;;  %s2079_s10 = sphi %s2111_s10, %s5011_s10   ;;  %s2075_s9 = sphi %s2109_s9, %s5010_s9  }
   0x7   : > { %p39_p0 = scmp.ne.s32.totalorder %s2079_s10, %s2075_s9  ;;  %p4393_p1 = scmp.eq.s32.totalorder %s2130_s13, 0 }
   0x8   : > { %p90_p3 = scmp.eq.s32.totalorder %s1468_s14, 1  ;;  %p1469_p5 = scmp.ge.s32.totalorder %s2087_s12, 1 }
   0x9   : > { %p2139_p4 = por %p4393_p1, %p39_p0  ;;  %p97_p7 = scmp.lt.s32.totalorder %s2087_s12, 3 }
   0xa   : > { %p2144_p6 = por %p90_p3, %p39_p0  ;;  %s2089_s18 = smov [#allocation5]  }
   0xb   : > { %s4543_s15 = scalar_select %p2139_p4, 1, 0 }
   0xc   : > { %s4544_s16 = scalar_select %p2144_p6, 1, 0 }
   0xd   : > { %p2149_p8 = pnand %p1469_p5, %p97_p7  ;;  %s110_s19 = sshll.u32 %s2089_s18, 4  ;;  %s111_s19 = int_to_ptr.vmem [resolvable:$true] %s110_s19 }
   0xe   : > { %s2157_s20 = sadd.s32 1, %s2087_s12   ;;  %s26_s24 = sadd.s32 1, %s2083_s11 }
   0xf   : > { %s4545_s17 = scalar_select %p2149_p8, 1, 0 }
  0x10   : > { %p1908_p10 = pneg %p2149_p8  ;;  %s23_s22 = ssub.s32 %s2087_s12, %s2157_s20 }
  0x11   : > { %p2167_p12 = scmp.eq.s32.totalorder %s23_s22, 0  ;;  %s1959_s27 = scalar_lea.hbm %s4391_s1, 128 }
  0x12   : > { %p2161_p11 = pnand %p1908_p10, %p4393_p1  ;;  %p1960_p0 = scmp.ne.s32.totalorder %s4391_s1, %s1959_s27 }
  0x13   : > { %s4547_s23 = scalar_select %p2167_p12, 1, 0 }
  0x14   : > { %p1961_p3 = pneg %p2161_p11  ;;  %p1966_p10 = scmp.lt.u32.totalorder %s1959_s27, %s4391_s1 }
  0x16   : > { %p1962_p5 = pnand %p1961_p3, %p1960_p0 }
  0x18   : > { %p1963_p7 = pneg %p1962_p5 }
  0x1a   : > { %p1968_p9 = pnand %p1966_p10, %p1963_p7 }
  0x1c   : > { %1971 = shalt.err (!%p1968_p9)
}
  0x1d   : > { %s1972_s4 = scalar_lea.vmem %s111_s19, 128  ;;  %p1980_p6 = scmp.lt.s32.totalorder %s111_s19, %s111_s19 }
  0x1e   : > { %p1973_p1 = scmp.ne.s32.totalorder %s111_s19, %s1972_s4  ;;  %p1981_p4 = scmp.lt.s32.totalorder %s1972_s4, %s1972_s4 }
  0x20   : > { %p1975_p2 = pnand %p1973_p1, %p1961_p3  ;;  %p1982_p8 = por %p1981_p4, %p1980_p6 }
  0x22   : > { %p1976_p13 = pneg %p1975_p2 }
  0x24   : > { %p1983_p12 = pnand %p1982_p8, %p1976_p13 }
  0x26   : > { %1986 = shalt.err (!%p1983_p12)
}
  0x27   : > { %1911 = dma.hbm_to_vmem [thread:$0]  (!%p2161_p11), %s4391_s1, 128, %s111_s19, [#allocation6]  }
  0x28   : > { %p4548_p1 = scmp.ne.s32.totalorder %s4547_s23, 0  ;;  %p34_p2 = scmp.eq.s32.totalorder %s2087_s12, 0 }
  0x29   : > { %p4549_p4 = scmp.ne.s32.totalorder %s2083_s11, %s2079_s10  ;;  %p4550_p6 = scmp.eq.s32.totalorder %s2130_s13, 1 }
  0x2a   : > { %s2193_s7 = scalar_select %p4548_p1, %s2083_s11, %s26_s24  }
  0x2b   : > { %p2201_p8 = por %p4550_p6, %p4549_p4  ;;  %p1921_p9 = scmp.lt.s32.totalorder %s2087_s12, 2 }
  0x2c   : > { %s121_s14 = sand.u32 1, %s2083_s11   ;;  %p4552_p12 = pmov %p4549_p4 }
  0x2d   : > { %s1472_s18 = sshll.u32 %s121_s14, 3  ;;  %s1473_s21 = sshll.u32 %s2087_s12, 7 }
  0x2e   : > { %p35_p13 = por %p34_p2, %p4552_p12  ;;  %s2214_s19 = scalar_lea.hbm %s4390_s0, %s1473_s21 }
  0x2f   : > { %s125_s23 = scalar_lea.vmem [#allocation2], %s1472_s18  ;;  %s122_s27 = scalar_lea.sflag [#allocation3], %s121_s14 }
  0x30   : > { %s132_s24 = sshll.u32 %s125_s23, 4  ;;  %p2216_p11 = pnand %p1921_p9, %p35_p13  ;;  %s2220_s24 = int_to_ptr.vmem [resolvable:$true] %s132_s24 }
  0x31   : > { %s1987_s28 = scalar_lea.hbm %s2214_s19, 128  ;;  %s1992_s3 = scalar_lea.hbm %s4390_s0, 256 }
  0x32   : > { %p1988_p0 = scmp.ne.s32.totalorder %s2214_s19, %s1987_s28  ;;  %p1989_p3 = pneg %p2216_p11 }
  0x33   : > { %p1993_p10 = scmp.lt.u32.totalorder %s2214_s19, %s4390_s0  ;;  %p1994_p1 = scmp.lt.u32.totalorder %s1992_s3, %s1987_s28 }
  0x34   : > { %p1990_p5 = pnand %p1989_p3, %p1988_p0  ;;  %p1996_p4 = scmp.lt.u32.totalorder %s1987_s28, %s2214_s19 }
  0x35   : > { %p1995_p2 = por %p1994_p1, %p1993_p10 }
  0x36   : > { %p1991_p7 = pneg %p1990_p5 }
  0x37   : > { %p1997_p6 = por %p1996_p4, %p1995_p2 }
  0x39   : > { %p1998_p9 = pnand %p1997_p6, %p1991_p7 }
  0x3b   : > { %2001 = shalt.err (!%p1998_p9)
}
  0x3c   : > { %s2002_s6 = scalar_lea.vmem %s2220_s24, 128  ;;  %s2090_s14 = smov [#allocation2]  }
  0x3d   : > { %p2003_p12 = scmp.ne.s32.totalorder %s2220_s24, %s2002_s6  ;;  %s2007_s18 = sshll.u32 %s2090_s14, 4  ;;  %s2008_s18 = int_to_ptr.vmem [resolvable:$false] %s2007_s18 }
  0x3e   : > { %s2009_s21 = scalar_lea.vmem %s2008_s18, 256  ;;  %p2010_p5 = scmp.lt.s32.totalorder %s2220_s24, %s2008_s18 }
  0x3f   : > { %p2005_p13 = pnand %p2003_p12, %p1989_p3  ;;  %p2011_p10 = scmp.lt.s32.totalorder %s2009_s21, %s2002_s6 }
  0x41   : > { %p2006_p0 = pneg %p2005_p13  ;;  %p2012_p1 = por %p2011_p10, %p2010_p5 }
  0x43   : > { %p2013_p2 = pnand %p2012_p1, %p2006_p0 }
  0x45   : > { %2016 = shalt.err (!%p2013_p2)
}
  0x46   : > { %1915 = dma.hbm_to_vmem [thread:$0]  (!%p2216_p11), %s2214_s19, 128, %s2220_s24, %s122_s27  }
  0x47   : > { %p4554_p7 = scmp.ne.s32.totalorder %s4545_s17, 0 }
  0x49   : > { %141 = sbr.rel (%p4554_p7) target bundleno = 646 (0x286), region = 28 }
  0x50   : > { %s2250_s22 = sand.u32 1, %s2079_s10   ;;  %p4555_p3 = scmp.ne.s32.totalorder %s4543_s15, 0 }
  0x51   : > { %s1475_s25 = sshll.u32 %s2250_s22, 3  ;;  %s144_s23 = scalar_lea.sflag [#allocation3], %s2250_s22 }
  0x52   : > { %s2254_s28 = scalar_lea.vmem [#allocation2], %s1475_s25 }
  0x53   : > { %2062 = dma.done.wait (%p4555_p3), %s144_s23, 128  }
  0x54   : > { %2064 = vsyncadd (%p4555_p3), %s144_s23, 4294967168  ;;  %v173_v0 = vlaneseq  ;;  %p4556_p11 = scmp.eq.s32.totalorder %s2130_s13, 0 }
  0x56   : > { %2066 = dma.done.wait (%p4556_p11), [#allocation6], 128   ;;  %p4557_p4 = pmov %p4556_p11 }
  0x57   : > { %v4428_v1 = vmov 0   ;;  %v2266_v2 = vshrl.u32 %v173_v0, 7  ;;  %v2268_v3 = vand.u32 127, %v173_v0  ;;  %v4430_v17 = vmov 1.0|1.0   ;;  %s1477_s15 = sshll.u32 %s2250_s22, 6 }
  0x58   : > { %2068 = vsyncadd (%p4557_p4), [#allocation6], 4294967168  ;;  %847 = vmatprep.mubr.bf16.mxu0 %v4428_v1  ;;  %888 = vmatprep.mubr.bf16.mxu1 %v4428_v1  ;;  %v4565_v24 = vmov 0  ;;  %v4569_v28 = vmov 0  ;;  %v4571_v31 = vmov 0  ;;  %v4573_v34 = vmov 0 }
  0x59   : > { %4558 = vst [vmem:[#allocation11_spill] sm:$0xff] %v2266_v2  ;;  %v175_v4 = vadd.s32 8, %v2266_v2  ;;  %v2272_v5 = vadd.s32 128, %v2268_v3  ;;  %v2275_v6 = vmul.u32 8, %v2266_v2  ;;  %v2278_v7 = vadd.s32 384, %v2268_v3  ;;  %s4327_s17 = scalar_lea.vmem [#allocation7], %s1477_s15 }
  0x5a   : > { %v176_v10 = vadd.s32 16, %v2266_v2  ;;  %v177_v11 = vadd.s32 24, %v2266_v2  ;;  %v2309_v14 = vadd.s32 256, %v2268_v3  ;;  %v178_v22 = vadd.s32 32, %v2266_v2  ;;  %s1867_s19 = sshll.u32 %s2130_s13, 10  ;;  %s1388_s24 = sshll.u32 %s4327_s17, 4  ;;  %s4346_s24 = int_to_ptr.vmem [resolvable:$true] %s1388_s24 }
  0x5b   : > { %v2280_v8 = vmul.u32 8, %v175_v4  ;;  %vm216_vm0 = vcmp.ge.s32.totalorder %v2272_v5, %v2275_v6  ;;  %v2285_v9 = vadd.s32 8, %v2275_v6  ;;  %vm218_vm1 = vcmp.ge.s32.totalorder %v2278_v7, %v2275_v6  ;;  %s4344_s29 = scalar_lea.hbm %s4392_s2, %s1867_s19  ;;  %s1374_s13 = scalar_lea.sflag [#allocation4], %s2250_s22 }
  0x5c   : > { %v2306_v13 = vmul.u32 8, %v176_v10  ;;  %v2311_v15 = vmul.u32 8, %v177_v11  ;;  %vm215_vm12 = vcmp.ge.s32.totalorder %v2268_v3, %v2275_v6  ;;  %v179_v23 = vadd.s32 40, %v2266_v2  ;;  %s2017_s30 = scalar_lea.vmem %s4346_s24, 1024  ;;  %s2093_s3 = smov [#allocation7]  }
  0x5d   : > { %vm224_vm2 = vcmp.ge.s32.totalorder %v2272_v5, %v2280_v8  ;;  %v2294_v12 = vadd.s32 8, %v2280_v8  ;;  %vm360_vm3 = vcmp.lt.s32.totalorder %v2272_v5, %v2285_v9  ;;  %vm362_vm5 = vcmp.lt.s32.totalorder %v2278_v7, %v2285_v9  ;;  %p2018_p6 = scmp.ne.s32.totalorder %s4346_s24, %s2017_s30  ;;  %s2021_s4 = sshll.u32 %s2093_s3, 4  ;;  %s2022_s4 = int_to_ptr.vmem [resolvable:$false] %s2021_s4 }
  0x5e   : > { %vm488_vm4 = vmand %vm216_vm0, %vm360_vm3  ;;  %vm226_vm7 = vcmp.ge.s32.totalorder %v2278_v7, %v2280_v8  ;;  %vm359_vm13 = vcmp.lt.s32.totalorder %v2268_v3, %v2285_v9  ;;  %vm223_vm15 = vcmp.ge.s32.totalorder %v2268_v3, %v2280_v8  ;;  %v2333_v19 = vadd.s32 8, %v2306_v13  ;;  %s2023_s5 = scalar_lea.vmem %s2022_s4, 2048  ;;  %p2024_p13 = scmp.lt.s32.totalorder %s4346_s24, %s2022_s4 }
  0x5f   : > { %vm368_vm6 = vcmp.lt.s32.totalorder %v2272_v5, %v2294_v12  ;;  %vm370_vm8 = vcmp.lt.s32.totalorder %v2278_v7, %v2294_v12  ;;  %vm490_vm9 = vmand %vm218_vm1, %vm362_vm5  ;;  %vm367_vm0 = vcmp.lt.s32.totalorder %v2268_v3, %v2294_v12  ;;  %vm217_vm3 = vcmp.ge.s32.totalorder %v2309_v14, %v2275_v6  ;;  %p2019_p9 = pnand %p2018_p6, %p2201_p8  ;;  %p2025_p0 = scmp.lt.s32.totalorder %s2023_s5, %s2017_s30 }
  0x60   : > { %vm496_vm10 = vmand %vm224_vm2, %vm368_vm6  ;;  %v2343_v20 = vadd.s32 8, %v2311_v15  ;;  %vm225_vm6 = vcmp.ge.s32.totalorder %v2309_v14, %v2280_v8  ;;  %v2381_v25 = vmul.u32 8, %v178_v22  ;;  %v2387_v27 = vmul.u32 8, %v179_v23 }
  0x61   : > { %vm2313_vm11 = vmpackc.low %vm496_vm10, %vm488_vm4  ;;  %vm361_vm4 = vcmp.lt.s32.totalorder %v2309_v14, %v2285_v9  ;;  %vm232_vm10 = vcmp.ge.s32.totalorder %v2272_v5, %v2306_v13  ;;  %v180_v32 = vadd.s32 48, %v2266_v2  ;;  %v181_v33 = vadd.s32 56, %v2266_v2  ;;  %p2020_p12 = pneg %p2019_p9  ;;  %p2026_p5 = por %p2025_p0, %p2024_p13 }
  0x62   : > { %1479 = vmatprep.subr.msk.bf16.mxu0 %vm2313_vm11, %v4430_v17  ;;  %vm498_vm14 = vmand %vm226_vm7, %vm370_vm8  ;;  %vm369_vm7 = vcmp.lt.s32.totalorder %v2309_v14, %v2294_v12  ;;  %v2405_v29 = vadd.s32 8, %v2381_v25  ;;  %v2415_v30 = vadd.s32 8, %v2387_v27  ;;  %v4575_v37 = vmov 0 }
  0x63   : > { %vm2328_vm1 = vmpackc.low %vm498_vm14, %vm490_vm9  ;;  %vm240_vm14 = vcmp.ge.s32.totalorder %v2272_v5, %v2311_v15  ;;  %v2453_v35 = vmul.u32 8, %v180_v32  ;;  %v2455_v36 = vmul.u32 8, %v181_v33  ;;  %v182_v38 = vadd.s32 64, %v2266_v2  ;;  %p2027_p10 = pnand %p2026_p5, %p2020_p12 }
  0x64   : > { %1511 = vmatprep.subr.msk.bf16.mxu1 %vm2328_vm1, %v4430_v17  ;;  %vm487_vm2 = vmand %vm215_vm12, %vm359_vm13  ;;  %vm376_vm12 = vcmp.lt.s32.totalorder %v2272_v5, %v2333_v19  ;;  %v183_v39 = vadd.s32 72, %v2266_v2  ;;  %v184_v40 = vadd.s32 80, %v2266_v2  ;;  %v185_v41 = vadd.s32 88, %v2266_v2 }
  0x65   : > { %vm495_vm5 = vmand %vm223_vm15, %vm367_vm0  ;;  %vm384_vm15 = vcmp.lt.s32.totalorder %v2272_v5, %v2343_v20  ;;  %v4577_v42 = vmov 0  ;;  %v2487_v43 = vadd.s32 8, %v2453_v35  ;;  %v2490_v44 = vadd.s32 8, %v2455_v36 }
  0x66   : > { %vm2349_vm8 = vmpackc.low %vm495_vm5, %vm487_vm2  ;;  %v2497_v45 = vmul.u32 8, %v182_v38  ;;  %v2499_v46 = vmul.u32 8, %v183_v39  ;;  %v186_v47 = vadd.s32 96, %v2266_v2  ;;  %v187_v48 = vadd.s32 104, %v2266_v2 }
  0x67   : > { %1481 = vmatpush1.bf16.msk.msra.mxu0 %vm2349_vm8, %v4430_v17  ;;  %vm489_vm9 = vmand %vm217_vm3, %vm361_vm4  ;;  %vm234_vm3 = vcmp.ge.s32.totalorder %v2278_v7, %v2306_v13  ;;  %vm378_vm4 = vcmp.lt.s32.totalorder %v2278_v7, %v2333_v19  ;;  %v2511_v49 = vadd.s32 640, %v2268_v3  ;;  %v4579_v50 = vmov 0 }
  0x68   : > { %vm497_vm13 = vmand %vm225_vm6, %vm369_vm7  ;;  %vm242_vm6 = vcmp.ge.s32.totalorder %v2278_v7, %v2311_v15  ;;  %vm386_vm7 = vcmp.lt.s32.totalorder %v2278_v7, %v2343_v20  ;;  %v2524_v51 = vadd.s32 896, %v2268_v3  ;;  %v2554_v52 = vadd.s32 8, %v2497_v45 }
  0x69   : > { %vm2366_vm0 = vmpackc.low %vm497_vm13, %vm489_vm9  ;;  %vm375_vm13 = vcmp.lt.s32.totalorder %v2268_v3, %v2333_v19  ;;  %v2557_v53 = vadd.s32 8, %v2499_v46  ;;  %v4583_v54 = vmov 0  ;;  %v2563_v55 = vmul.u32 8, %v184_v40 }
  0x6a   : > { %v4566_v24 = vsel %vm2366_vm0, 4294967295, %v4565_v24  ;;  %1513 = vmatpush1.bf16.msk.msra.mxu1 %vm2366_vm0, %v4430_v17  ;;  %vm504_vm2 = vmand %vm232_vm10, %vm376_vm12  ;;  %vm231_vm12 = vcmp.ge.s32.totalorder %v2268_v3, %v2306_v13  ;;  %v2565_v56 = vmul.u32 8, %v185_v41  ;;  %v2598_v57 = vmul.u32 8, %v186_v47 }
  0x6b   : > { %vm512_vm5 = vmand %vm240_vm14, %vm384_vm15  ;;  %vm239_vm15 = vcmp.ge.s32.totalorder %v2268_v3, %v2311_v15  ;;  %v2600_v58 = vmul.u32 8, %v187_v48  ;;  %v4587_v59 = vmov 0  ;;  %v188_v60 = vadd.s32 112, %v2266_v2 }
  0x6c   : > { %vm2383_vm9 = vmpackc.low %vm512_vm5, %vm504_vm2  ;;  %vm383_vm2 = vcmp.lt.s32.totalorder %v2268_v3, %v2343_v20  ;;  %v2641_v61 = vadd.s32 8, %v2563_v55  ;;  %v2644_v62 = vadd.s32 8, %v2565_v56  ;;  %v189_v63 = vadd.s32 120, %v2266_v2 }
  0x6d   : > { %1483 = vmatprep.subr.msk.bf16.mxu0 %vm2383_vm9, %v4430_v17  ;;  %vm506_vm10 = vmand %vm234_vm3, %vm378_vm4  ;;  %vm233_vm4 = vcmp.ge.s32.totalorder %v2309_v14, %v2306_v13  ;;  %v4593_v0 = vmov 0  ;;  %v2656_v4 = vadd.s32 8, %v2598_v57  ;;  %v2659_v10 = vadd.s32 8, %v2600_v58 }
  0x6e   : > { %vm514_vm14 = vmand %vm242_vm6, %vm386_vm7  ;;  %vm377_vm6 = vcmp.lt.s32.totalorder %v2309_v14, %v2333_v19  ;;  %v2674_v11 = vmul.u32 8, %v188_v60  ;;  %v2677_v22 = vadd.s32 512, %v2268_v3  ;;  %v2680_v23 = vadd.s32 768, %v2268_v3 }
  0x6f   : > { %vm2400_vm5 = vmpackc.low %vm514_vm14, %vm506_vm10  ;;  %vm241_vm10 = vcmp.ge.s32.totalorder %v2309_v14, %v2311_v15  ;;  %vm385_vm14 = vcmp.lt.s32.totalorder %v2309_v14, %v2343_v20  ;;  %v4599_v32 = vmov 0  ;;  %v2710_v33 = vmul.u32 8, %v189_v63 }
  0x70   : > { %v4570_v28 = vsel %vm2400_vm5, 4294967295, %v4569_v28  ;;  %1515 = vmatprep.subr.msk.bf16.mxu1 %vm2400_vm5, %v4430_v17  ;;  %vm503_vm3 = vmand %vm231_vm12, %vm375_vm13  ;;  %vm248_vm13 = vcmp.ge.s32.totalorder %v2272_v5, %v2381_v25  ;;  %v2746_v38 = vadd.s32 8, %v2674_v11  ;;  %v4605_v39 = vmov 0 }
  0x71   : > { %vm511_vm7 = vmand %vm239_vm15, %vm383_vm2  ;;  %vm392_vm15 = vcmp.lt.s32.totalorder %v2272_v5, %v2405_v29  ;;  %v2780_v40 = vadd.s32 8, %v2710_v33  ;;  %v4611_v41 = vmov 0  ;;  %v4617_v47 = vmov 0 }
  0x72   : > { %vm2421_vm0 = vmpackc.low %vm511_vm7, %vm503_vm3  ;;  %vm256_vm3 = vcmp.ge.s32.totalorder %v2272_v5, %v2387_v27  ;;  %vm400_vm7 = vcmp.lt.s32.totalorder %v2272_v5, %v2415_v30  ;;  %v4623_v48 = vmov 0  ;;  %v4629_v60 = vmov 0 }
  0x73   : > { %v4572_v31 = vsel %vm2421_vm0, 4294967295, %v4571_v31  ;;  %1485 = vmatpush1.bf16.msk.msra.mxu0 %vm2421_vm0, %v4430_v17  ;;  %vm505_vm12 = vmand %vm233_vm4, %vm377_vm6  ;;  %vm250_vm6 = vcmp.ge.s32.totalorder %v2278_v7, %v2381_v25  ;;  %vm258_vm0 = vcmp.ge.s32.totalorder %v2278_v7, %v2387_v27  ;;  %v4636_v63 = vmov 0 }
  0x74   : > { %vm513_vm2 = vmand %vm241_vm10, %vm385_vm14  ;;  %vm394_vm10 = vcmp.lt.s32.totalorder %v2278_v7, %v2405_v29  ;;  %v4643_v1 = vmov 0  ;;  %v4653_v2 = vmov 1.0|1.0  }
  0x75   : > { %vm2438_vm5 = vmpackc.low %vm513_vm2, %vm505_vm12  ;;  %vm402_vm12 = vcmp.lt.s32.totalorder %v2278_v7, %v2415_v30 }
  0x76   : > { %v4574_v34 = vsel %vm2438_vm5, 4294967295, %v4573_v34  ;;  %1517 = vmatpush1.bf16.msk.msra.mxu1 %vm2438_vm5, %v4430_v17  ;;  %vm520_vm4 = vmand %vm248_vm13, %vm392_vm15  ;;  %vm247_vm15 = vcmp.ge.s32.totalorder %v2268_v3, %v2381_v25 }
  0x77   : > { %vm528_vm14 = vmand %vm256_vm3, %vm400_vm7  ;;  %vm391_vm3 = vcmp.lt.s32.totalorder %v2268_v3, %v2405_v29 }
  0x78   : > { %vm2457_vm2 = vmpackc.low %vm528_vm14, %vm520_vm4  ;;  %vm255_vm4 = vcmp.ge.s32.totalorder %v2268_v3, %v2387_v27  ;;  %vm399_vm14 = vcmp.lt.s32.totalorder %v2268_v3, %v2415_v30 }
  0x79   : > { %v4576_v37 = vsel %vm2457_vm2, 4294967295, %v4575_v37  ;;  %1487 = vmatprep.subr.msk.bf16.mxu0 %vm2457_vm2, %v4430_v17  ;;  %vm522_vm13 = vmand %vm250_vm6, %vm394_vm10  ;;  %vm4582_vm10 = vcmp.ge.s32.totalorder %v2309_v14, %v2387_v27  ;;  %vm321_vm2 = vcmp.ge.s32.totalorder %v2309_v14, %v2600_v58 }
  0x7a   : > { %vm530_vm7 = vmand %vm258_vm0, %vm402_vm12  ;;  %vm393_vm0 = vcmp.lt.s32.totalorder %v2309_v14, %v2405_v29 }
  0x7b   : > { %vm2478_vm6 = vmpackc.low %vm530_vm7, %vm522_vm13  ;;  %vm401_vm13 = vcmp.lt.s32.totalorder %v2309_v14, %v2415_v30 }
  0x7c   : > { %v4578_v42 = vsel %vm2478_vm6, 4294967295, %v4577_v42  ;;  %1519 = vmatprep.subr.msk.bf16.mxu1 %vm2478_vm6, %v4430_v17  ;;  %vm519_vm12 = vmand %vm247_vm15, %vm391_vm3  ;;  %vm4586_vm3 = vcmp.ge.s32.totalorder %v2272_v5, %v2455_v36 }
  0x7d   : > { %vm527_vm7 = vmand %vm255_vm4, %vm399_vm14  ;;  %vm408_vm4 = vcmp.lt.s32.totalorder %v2272_v5, %v2487_v43  ;;  %vm416_vm14 = vcmp.lt.s32.totalorder %v2272_v5, %v2490_v44 }
  0x7e   : > { %vm2513_vm15 = vmpackc.low %vm527_vm7, %vm519_vm12  ;;  %vm4581_vm12 = vcmp.ge.s32.totalorder %v2309_v14, %v2381_v25 }
  0x7f   : > { %v4580_v50 = vsel %vm2513_vm15, 4294967295, %v4579_v50  ;;  %1489 = vmatpush1.bf16.msk.msra.mxu0 %vm2513_vm15, %v4430_v17  ;;  %vm521_vm7 = vmand %vm4581_vm12, %vm393_vm0 }
  0x80   : > { %vm529_vm15 = vmand %vm4582_vm10, %vm401_vm13 }
  0x81   : > { %vm2559_vm5 = vmpackc.low %vm529_vm15, %vm521_vm7  ;;  %vm4585_vm15 = vcmp.ge.s32.totalorder %v2272_v5, %v2453_v35 }
  0x82   : > { %v4584_v54 = vsel %vm2559_vm5, 4294967295, %v4583_v54  ;;  %1521 = vmatpush1.bf16.msk.msra.mxu1 %vm2559_vm5, %v4430_v17  ;;  %vm536_vm7 = vmand %vm4585_vm15, %vm408_vm4  ;;  %vm4592_vm4 = vcmp.ge.s32.totalorder %v2278_v7, %v2455_v36 }
  0x83   : > { %vm544_vm5 = vmand %vm4586_vm3, %vm416_vm14  ;;  %vm4591_vm3 = vcmp.lt.s32.totalorder %v2278_v7, %v2490_v44 }
  0x84   : > { %vm2602_vm13 = vmpackc.low %vm544_vm5, %vm536_vm7  ;;  %vm4589_vm5 = vcmp.lt.s32.totalorder %v2278_v7, %v2487_v43  ;;  %vm4590_vm7 = vcmp.ge.s32.totalorder %v2278_v7, %v2453_v35 }
  0x85   : > { %v4588_v59 = vsel %vm2602_vm13, 4294967295, %v4587_v59  ;;  %1491 = vmatprep.subr.msk.bf16.mxu0 %vm2602_vm13, %v4430_v17  ;;  %vm538_vm10 = vmand %vm4590_vm7, %vm4589_vm5  ;;  %vm4597_vm5 = vcmp.lt.s32.totalorder %v2268_v3, %v2490_v44  ;;  %vm4598_vm7 = vcmp.ge.s32.totalorder %v2268_v3, %v2455_v36 }
  0x86   : > { %vm546_vm13 = vmand %vm4592_vm4, %vm4591_vm3  ;;  %vm4596_vm4 = vcmp.ge.s32.totalorder %v2268_v3, %v2453_v35 }
  0x87   : > { %vm2647_vm0 = vmpackc.low %vm546_vm13, %vm538_vm10  ;;  %vm4595_vm13 = vcmp.lt.s32.totalorder %v2268_v3, %v2487_v43 }
  0x88   : > { %v4594_v0 = vsel %vm2647_vm0, 4294967295, %v4593_v0  ;;  %1523 = vmatprep.subr.msk.bf16.mxu1 %vm2647_vm0, %v4430_v17  ;;  %vm535_vm3 = vmand %vm4596_vm4, %vm4595_vm13  ;;  %vm4602_vm0 = vcmp.ge.s32.totalorder %v2309_v14, %v2453_v35  ;;  %vm4604_vm4 = vcmp.ge.s32.totalorder %v2309_v14, %v2455_v36 }
  0x89   : > { %vm543_vm15 = vmand %vm4598_vm7, %vm4597_vm5  ;;  %vm4603_vm7 = vcmp.lt.s32.totalorder %v2309_v14, %v2490_v44  ;;  %vm4608_vm5 = vcmp.ge.s32.totalorder %v2272_v5, %v2497_v45 }
  0x8a   : > { %vm2702_vm6 = vmpackc.low %vm543_vm15, %vm535_vm3  ;;  %vm4601_vm3 = vcmp.lt.s32.totalorder %v2309_v14, %v2487_v43  ;;  %vm4620_vm15 = vcmp.ge.s32.totalorder %v2268_v3, %v2497_v45 }
  0x8b   : > { %v4600_v32 = vsel %vm2702_vm6, 4294967295, %v4599_v32  ;;  %1493 = vmatpush1.bf16.msk.msra.mxu0 %vm2702_vm6, %v4430_v17  ;;  %vm537_vm14 = vmand %vm4602_vm0, %vm4601_vm3 }
  0x8c   : > { %vm545_vm13 = vmand %vm4604_vm4, %vm4603_vm7  ;;  %vm4609_vm4 = vcmp.lt.s32.totalorder %v2272_v5, %v2557_v53  ;;  %vm4610_vm7 = vcmp.ge.s32.totalorder %v2272_v5, %v2499_v46 }
  0x8d   : > { %vm2754_vm12 = vmpackc.low %vm545_vm13, %vm537_vm14  ;;  %vm4607_vm13 = vcmp.lt.s32.totalorder %v2272_v5, %v2554_v52 }
  0x8e   : > { %v4606_v39 = vsel %vm2754_vm12, 4294967295, %v4605_v39  ;;  %1525 = vmatpush1.bf16.msk.msra.mxu1 %vm2754_vm12, %v4430_v17  ;;  %vm552_vm0 = vmand %vm4608_vm5, %vm4607_vm13  ;;  %vm4614_vm12 = vcmp.ge.s32.totalorder %v2278_v7, %v2497_v45  ;;  %vm4616_vm5 = vcmp.ge.s32.totalorder %v2278_v7, %v2499_v46 }
  0x8f   : > { %vm560_vm3 = vmand %vm4610_vm7, %vm4609_vm4  ;;  %vm4615_vm7 = vcmp.lt.s32.totalorder %v2278_v7, %v2557_v53 }
  0x90   : > { %vm2806_vm6 = vmpackc.low %vm560_vm3, %vm552_vm0  ;;  %vm4613_vm3 = vcmp.lt.s32.totalorder %v2278_v7, %v2554_v52  ;;  %vm4626_vm0 = vcmp.ge.s32.totalorder %v2309_v14, %v2497_v45 }
  0x91   : > { %v4612_v41 = vsel %vm2806_vm6, 4294967295, %v4611_v41  ;;  %1495 = vmatprep.subr.msk.bf16.mxu0 %vm2806_vm6, %v4430_v17  ;;  %vm554_vm10 = vmand %vm4614_vm12, %vm4613_vm3  ;;  %vm4622_vm12 = vcmp.ge.s32.totalorder %v2268_v3, %v2499_v46 }
  0x92   : > { %vm562_vm13 = vmand %vm4616_vm5, %vm4615_vm7  ;;  %vm4621_vm7 = vcmp.lt.s32.totalorder %v2268_v3, %v2557_v53 }
  0x93   : > { %vm2857_vm6 = vmpackc.low %vm562_vm13, %vm554_vm10  ;;  %vm4619_vm13 = vcmp.lt.s32.totalorder %v2268_v3, %v2554_v52  ;;  %vm4633_vm10 = vcmp.ge.s32.totalorder %v2272_v5, %v2563_v55 }
  0x94   : > { %v4618_v47 = vsel %vm2857_vm6, 4294967295, %v4617_v47  ;;  %1527 = vmatprep.subr.msk.bf16.mxu1 %vm2857_vm6, %v4430_v17  ;;  %vm551_vm14 = vmand %vm4620_vm15, %vm4619_vm13  ;;  %vm4628_vm15 = vcmp.ge.s32.totalorder %v2309_v14, %v2499_v46 }
  0x95   : > { %vm559_vm3 = vmand %vm4622_vm12, %vm4621_vm7  ;;  %vm4627_vm7 = vcmp.lt.s32.totalorder %v2309_v14, %v2557_v53 }
  0x96   : > { %vm2908_vm6 = vmpackc.low %vm559_vm3, %vm551_vm14  ;;  %vm4625_vm3 = vcmp.lt.s32.totalorder %v2309_v14, %v2554_v52  ;;  %vm4640_vm14 = vcmp.ge.s32.totalorder %v2278_v7, %v2563_v55 }
  0x97   : > { %v4624_v48 = vsel %vm2908_vm6, 4294967295, %v4623_v48  ;;  %1497 = vmatpush1.bf16.msk.msra.mxu0 %vm2908_vm6, %v4430_v17  ;;  %vm553_vm4 = vmand %vm4626_vm0, %vm4625_vm3  ;;  %vm4635_vm0 = vcmp.ge.s32.totalorder %v2272_v5, %v2565_v56 }
  0x98   : > { %vm561_vm13 = vmand %vm4628_vm15, %vm4627_vm7  ;;  %vm4634_vm7 = vcmp.lt.s32.totalorder %v2272_v5, %v2644_v62 }
  0x99   : > { %vm2959_vm6 = vmpackc.low %vm561_vm13, %vm553_vm4  ;;  %vm4632_vm13 = vcmp.lt.s32.totalorder %v2272_v5, %v2641_v61 }
  0x9a   : > { %v4630_v60 = vsel %vm2959_vm6, 4294967295, %v4629_v60  ;;  %1529 = vmatpush1.bf16.msk.msra.mxu1 %vm2959_vm6, %v4430_v17  ;;  %vm568_vm5 = vmand %vm4633_vm10, %vm4632_vm13  ;;  %vm4642_vm10 = vcmp.ge.s32.totalorder %v2278_v7, %v2565_v56 }
  0x9b   : > { %4631 = vst [vmem:[#allocation12_spill] sm:$0xff] %v4630_v60  ;;  %vm576_vm3 = vmand %vm4635_vm0, %vm4634_vm7  ;;  %vm4641_vm7 = vcmp.lt.s32.totalorder %v2278_v7, %v2644_v62  ;;  %v4673_v60 = vmov 0 }
  0x9c   : > { %vm3010_vm6 = vmpackc.low %vm576_vm3, %vm568_vm5  ;;  %vm4639_vm3 = vcmp.lt.s32.totalorder %v2278_v7, %v2641_v61 }
  0x9d   : > { %v4637_v63 = vsel %vm3010_vm6, 4294967295, %v4636_v63  ;;  %1499 = vmatprep.subr.msk.bf16.mxu0 %vm3010_vm6, %v4430_v17  ;;  %vm570_vm12 = vmand %vm4640_vm14, %vm4639_vm3  ;;  %vm4649_vm14 = vcmp.ge.s32.totalorder %v2268_v3, %v2565_v56 }
  0x9e   : > { %4638 = vst [vmem:[#allocation13_spill] sm:$0xff] %v4637_v63  ;;  %vm578_vm13 = vmand %vm4642_vm10, %vm4641_vm7  ;;  %vm4648_vm10 = vcmp.lt.s32.totalorder %v2268_v3, %v2644_v62  ;;  %vm4656_vm7 = vcmp.lt.s32.totalorder %v2309_v14, %v2644_v62  ;;  %v4677_v63 = vmov 0 }
  0x9f   : > { %vm3061_vm6 = vmpackc.low %vm578_vm13, %vm570_vm12  ;;  %vm4646_vm12 = vcmp.lt.s32.totalorder %v2268_v3, %v2641_v61  ;;  %vm4647_vm13 = vcmp.ge.s32.totalorder %v2268_v3, %v2563_v55 }
  0xa0   : > { %v4644_v1 = vsel %vm3061_vm6, 4294967295, %v4643_v1  ;;  %1531 = vmatprep.subr.msk.bf16.mxu1 %vm3061_vm6, %v4430_v17  ;;  %vm567_vm4 = vmand %vm4647_vm13, %vm4646_vm12  ;;  %v4650_v17 = vmov 0  ;;  %vm4657_vm12 = vcmp.ge.s32.totalorder %v2309_v14, %v2565_v56 }
  0xa1   : > { %4645 = vst [vmem:[#allocation14_spill] sm:$0xff] %v4644_v1  ;;  %vm575_vm3 = vmand %vm4649_vm14, %vm4648_vm10  ;;  %vm4663_vm14 = vcmp.lt.s32.totalorder %v2272_v5, %v2659_v10  ;;  %v807_v1 = vld [vmem:[%s2254_s28] sm:$0xff] }
  0xa2   : > { %vm3104_vm0 = vmpackc.low %vm575_vm3, %vm567_vm4  ;;  %vm4654_vm4 = vcmp.lt.s32.totalorder %v2309_v14, %v2641_v61  ;;  %vm4655_vm3 = vcmp.ge.s32.totalorder %v2309_v14, %v2563_v55 }
  0xa3   : > { %v4651_v17 = vsel %vm3104_vm0, 4294967295, %v4650_v17  ;;  %1501 = vmatpush1.bf16.msk.msra.mxu0 %vm3104_vm0, %v4653_v2  ;;  %vm569_vm5 = vmand %vm4655_vm3, %vm4654_vm4  ;;  %vm4664_vm4 = vcmp.ge.s32.totalorder %v2272_v5, %v2600_v58  ;;  %vm311_vm3 = vcmp.ge.s32.totalorder %v2268_v3, %v2598_v57 }
  0xa4   : > { %4652 = vst [vmem:[#allocation15_spill] sm:$0xff] %v4651_v17  ;;  %vm577_vm0 = vmand %vm4657_vm12, %vm4656_vm7  ;;  %v4658_v17 = vmov 0  ;;  %vm466_vm12 = vcmp.lt.s32.totalorder %v2278_v7, %v2659_v10  ;;  %vm319_vm7 = vcmp.ge.s32.totalorder %v2268_v3, %v2600_v58 }
  0xa5   : > { %vm3147_vm15 = vmpackc.low %vm577_vm0, %vm569_vm5  ;;  %vm4661_vm0 = vcmp.lt.s32.totalorder %v2272_v5, %v2656_v4  ;;  %vm4662_vm5 = vcmp.ge.s32.totalorder %v2272_v5, %v2598_v57 }
  0xa6   : > { %v4659_v17 = vsel %vm3147_vm15, 4294967295, %v4658_v17  ;;  %1533 = vmatpush1.bf16.msk.msra.mxu1 %vm3147_vm15, %v4653_v2  ;;  %vm584_vm13 = vmand %vm4662_vm5, %vm4661_vm0  ;;  %vm322_vm5 = vcmp.ge.s32.totalorder %v2278_v7, %v2600_v58 }
  0xa7   : > { %4660 = vst [vmem:[#allocation16_spill] sm:$0xff] %v4659_v17  ;;  %vm592_vm0 = vmand %vm4664_vm4, %vm4663_vm14  ;;  %v4665_v17 = vmov 0  ;;  %vm4668_vm14 = vcmp.lt.s32.totalorder %v2278_v7, %v2656_v4  ;;  %vm4669_vm4 = vcmp.ge.s32.totalorder %v2278_v7, %v2598_v57 }
  0xa8   : > { %vm3190_vm10 = vmpackc.low %vm592_vm0, %vm584_vm13  ;;  %vm455_vm13 = vcmp.lt.s32.totalorder %v2268_v3, %v2656_v4 }
  0xa9   : > { %v4666_v17 = vsel %vm3190_vm10, 4294967295, %v4665_v17  ;;  %1503 = vmatprep.subr.msk.bf16.mxu0 %vm3190_vm10, %v4653_v2  ;;  %vm586_vm15 = vmand %vm4669_vm4, %vm4668_vm14  ;;  %vm463_vm10 = vcmp.lt.s32.totalorder %v2268_v3, %v2659_v10  ;;  %vm313_vm4 = vcmp.ge.s32.totalorder %v2309_v14, %v2598_v57 }
  0xaa   : > { %4667 = vst [vmem:[#allocation17_spill] sm:$0xff] %v4666_v17  ;;  %vm594_vm0 = vmand %vm322_vm5, %vm466_vm12  ;;  %v4670_v17 = vmov 0  ;;  %vm457_vm12 = vcmp.lt.s32.totalorder %v2309_v14, %v2656_v4 }
  0xab   : > { %vm3211_vm6 = vmpackc.low %vm594_vm0, %vm586_vm15  ;;  %vm465_vm15 = vcmp.lt.s32.totalorder %v2309_v14, %v2659_v10 }
  0xac   : > { %v4671_v17 = vsel %vm3211_vm6, 4294967295, %v4670_v17  ;;  %1535 = vmatprep.subr.msk.bf16.mxu1 %vm3211_vm6, %v4653_v2  ;;  %vm583_vm14 = vmand %vm311_vm3, %vm455_vm13 }
  0xad   : > { %4672 = vst [vmem:[#allocation18_spill] sm:$0xff] %v4671_v17  ;;  %vm591_vm5 = vmand %vm319_vm7, %vm463_vm10  ;;  %v3231_v17 = vpack.c.bf16 %v807_v1, %v807_v1  ;;  %vm328_vm10 = vcmp.ge.s32.totalorder %v2272_v5, %v2674_v11  ;;  %vm472_vm7 = vcmp.lt.s32.totalorder %v2272_v5, %v2746_v38 }
  0xae   : > { %vm3227_vm0 = vmpackc.low %vm591_vm5, %vm583_vm14  ;;  %vm336_vm14 = vcmp.ge.s32.totalorder %v2272_v5, %v2710_v33  ;;  %vm480_vm5 = vcmp.lt.s32.totalorder %v2272_v5, %v2780_v40  ;;  %v4680_v5 = vmov 0 }
  0xaf   : > { %v4674_v60 = vsel %vm3227_vm0, 4294967295, %v4673_v60  ;;  %4676 = vst [vmem:[#allocation20_spill] sm:$0xff] %v3231_v17  ;;  %1505 = vmatpush1.bf16.msk.msra.mxu0 %vm3227_vm0, %v4653_v2  ;;  %vm585_vm3 = vmand %vm313_vm4, %vm457_vm12  ;;  %vm330_vm12 = vcmp.ge.s32.totalorder %v2278_v7, %v2674_v11 }
  0xb0   : > { %4675 = vst [vmem:[#allocation19_spill] sm:$0xff] %v4674_v60  ;;  %vm593_vm13 = vmand %vm321_vm2, %vm465_vm15  ;;  %vm474_vm2 = vcmp.lt.s32.totalorder %v2278_v7, %v2746_v38  ;;  %v809_v60 = vunpack.c.l.bf16 %v3231_v17  ;;  %v4684_v17 = vmov 0 }
  0xb1   : > { %vm3244_vm6 = vmpackc.low %vm593_vm13, %vm585_vm3  ;;  %vm338_vm3 = vcmp.ge.s32.totalorder %v2278_v7, %v2710_v33  ;;  %vm482_vm13 = vcmp.lt.s32.totalorder %v2278_v7, %v2780_v40 }
  0xb2   : > { %v4678_v63 = vsel %vm3244_vm6, 4294967295, %v4677_v63  ;;  %1537 = vmatpush1.bf16.msk.msra.mxu1 %vm3244_vm6, %v4653_v2  ;;  %vm600_vm4 = vmand %vm328_vm10, %vm472_vm7  ;;  %vm327_vm7 = vcmp.ge.s32.totalorder %v2268_v3, %v2674_v11  ;;  %vm335_vm6 = vcmp.ge.s32.totalorder %v2268_v3, %v2710_v33  ;;  %v3275_v7 = vsub.f32 %v807_v1, %v809_v60 }
  0xb3   : > { %4679 = vst [vmem:[#allocation21_spill] sm:$0xff] %v4678_v63  ;;  %vm608_vm15 = vmand %vm336_vm14, %vm480_vm5  ;;  %vm471_vm14 = vcmp.lt.s32.totalorder %v2268_v3, %v2746_v38  ;;  %v4686_v1 = vmov 0  ;;  %v4688_v60 = vmov 0 }
  0xb4   : > { %vm3260_vm0 = vmpackc.low %vm608_vm15, %vm600_vm4  ;;  %vm479_vm4 = vcmp.lt.s32.totalorder %v2268_v3, %v2780_v40  ;;  %4683 = vst [vmem:[#allocation23_spill] sm:$0xff] %v3275_v7  ;;  %v3298_v3 = vpack.c.bf16 %v3275_v7, %v3275_v7  ;;  %v4696_v7 = vmov 0 }
  0xb5   : > { %v4681_v5 = vsel %vm3260_vm0, 4294967295, %v4680_v5  ;;  %1507 = vmatprep.subr.msk.bf16.mxu0 %vm3260_vm0, %v4653_v2  ;;  %vm602_vm10 = vmand %vm330_vm12, %vm474_vm2  ;;  %vm329_vm2 = vcmp.ge.s32.totalorder %v2309_v14, %v2674_v11  ;;  %vm337_vm0 = vcmp.ge.s32.totalorder %v2309_v14, %v2710_v33 }
  0xb6   : > { %4682 = vst [vmem:[#allocation22_spill] sm:$0xff] %v4681_v5  ;;  %vm610_vm5 = vmand %vm338_vm3, %vm482_vm13  ;;  %vm473_vm3 = vcmp.lt.s32.totalorder %v2309_v14, %v2746_v38  ;;  %v812_v16 = vunpack.c.l.bf16 %v3298_v3 }
  0xb7   : > { %vm3277_vm15 = vmpackc.low %vm610_vm5, %vm602_vm10  ;;  %vm481_vm10 = vcmp.lt.s32.totalorder %v2309_v14, %v2780_v40  ;;  %v4695_v14 = vmov 0   ;;  %v4973_v26 = vld [vmem:[#allocation19_spill] sm:$0xff] }
  0xb8   : > { %v4685_v17 = vsel %vm3277_vm15, 4294967295, %v4684_v17  ;;  %1539 = vmatprep.subr.msk.bf16.mxu1 %vm3277_vm15, %v4653_v2  ;;  %vm599_vm12 = vmand %vm327_vm7, %vm471_vm14 }
  0xb9   : > { %vm607_vm13 = vmand %vm335_vm6, %vm479_vm4  ;;  %vm4691_vm4 = vcmp.lt.s32.totalorder %v2511_v49, %v2285_v9 }
  0xba   : > { %vm3292_vm5 = vmpackc.low %vm607_vm13, %vm599_vm12  ;;  %vm4692_vm12 = vcmp.ge.s32.totalorder %v2511_v49, %v2275_v6 }
  0xbb   : > { %v4687_v1 = vsel %vm3292_vm5, 4294967295, %v4686_v1  ;;  %1509 = vmatpush1.bf16.msk.msra.mxu0 %vm3292_vm5, %v4653_v2  ;;  %vm601_vm7 = vmand %vm329_vm2, %vm473_vm3  ;;  %vm4694_vm2 = vcmp.ge.s32.totalorder %v2511_v49, %v2280_v8  ;;  %v4971_v18 = vld [vmem:[#allocation23_spill] sm:$0xff] }
  0xbc   : > { %vm609_vm6 = vmand %vm337_vm0, %vm481_vm10  ;;  %vm4693_vm0 = vcmp.lt.s32.totalorder %v2511_v49, %v2294_v12  ;;  %v813_v21 = vsub.f32 %v4971_v18, %v812_v16 }
  0xbd   : > { %vm3303_vm14 = vmpackc.low %vm609_vm6, %vm601_vm7  ;;  %vm4699_vm7 = vcmp.lt.s32.totalorder %v2524_v51, %v2285_v9  ;;  %vm4700_vm6 = vcmp.ge.s32.totalorder %v2524_v51, %v2275_v6 }
  0xbe   : > { %v4689_v60 = vsel %vm3303_vm14, 4294967295, %v4688_v60  ;;  %1541 = vmatpush1.bf16.msk.msra.mxu1 %vm3303_vm14, %v4653_v2  ;;  %vm492_vm13 = vmand %vm4692_vm12, %vm4691_vm4  ;;  %848 = vmatmul.mubr.bf16.vlgmr.msra.gmra.mrb[0].mxu0 %v3298_v3  ;;  %vm4701_vm12 = vcmp.lt.s32.totalorder %v2524_v51, %v2294_v12  ;;  %vm4714_vm14 = vcmp.lt.s32.totalorder %v2680_v23, %v2294_v12 }
  0xbf   : > { %4690 = vst [vmem:[#allocation24_spill] sm:$0xff] %v4689_v60  ;;  %vm500_vm3 = vmand %vm4694_vm2, %vm4693_vm0  ;;  %929 = vmatprep.mubr.bf16.mxu0 %v4695_v14  ;;  %v4703_v60 = vmov 0 }
  0xc0   : > { %vm3324_vm10 = vmpackc.low %vm500_vm3, %vm492_vm13  ;;  %vm4702_vm13 = vcmp.ge.s32.totalorder %v2524_v51, %v2280_v8  ;;  %vm4706_vm3 = vcmp.lt.s32.totalorder %v2677_v22, %v2285_v9 }
  0xc1   : > { %v4697_v7 = vsel %vm3324_vm10, 4294967295, %v4696_v7  ;;  %1543 = vmatprep.subr.msk.bf16.mxu0 %vm3324_vm10, %v4653_v2  ;;  %vm494_vm4 = vmand %vm4700_vm6, %vm4699_vm7  ;;  %889 = vmatmul.mubr.bf16.vlgmr.msra.gmra.mrb[0].mxu1 %v3298_v3  ;;  %vm4707_vm7 = vcmp.ge.s32.totalorder %v2677_v22, %v2275_v6 }
  0xc2   : > { %4698 = vst [vmem:[#allocation25_spill] sm:$0xff] %v4697_v7  ;;  %vm502_vm0 = vmand %vm4702_vm13, %vm4701_vm12  ;;  %970 = vmatprep.mubr.bf16.mxu1 %v4695_v14  ;;  %vm4708_vm12 = vcmp.lt.s32.totalorder %v2677_v22, %v2294_v12  ;;  %v4710_v7 = vmov 0  ;;  %v4740_v12 = vmov 0 }
  0xc3   : > { %vm3345_vm2 = vmpackc.low %vm502_vm0, %vm494_vm4  ;;  %vm4709_vm4 = vcmp.ge.s32.totalorder %v2677_v22, %v2280_v8 }
  0xc4   : > { %v4704_v60 = vsel %vm3345_vm2, 4294967295, %v4703_v60  ;;  %1575 = vmatprep.subr.msk.bf16.mxu1 %vm3345_vm2, %v4653_v2  ;;  %vm491_vm6 = vmand %vm4707_vm7, %vm4706_vm3  ;;  %vm4712_vm2 = vcmp.lt.s32.totalorder %v2680_v23, %v2285_v9  ;;  %vm4713_vm3 = vcmp.ge.s32.totalorder %v2680_v23, %v2275_v6  ;;  %v4722_v6 = vmov 0 }
  0xc5   : > { %4705 = vst [vmem:[#allocation26_spill] sm:$0xff] %v4704_v60  ;;  %vm499_vm13 = vmand %vm4709_vm4, %vm4708_vm12  ;;  %v4716_v60 = vmov 0  ;;  %v4734_v9 = vmov 0 }
  0xc6   : > { %vm3364_vm0 = vmpackc.low %vm499_vm13, %vm491_vm6  ;;  %vm4715_vm6 = vcmp.ge.s32.totalorder %v2680_v23, %v2280_v8  ;;  %vm4718_vm13 = vcmp.lt.s32.totalorder %v2511_v49, %v2333_v19  ;;  %v4728_v8 = vmov 0 }
  0xc7   : > { %v4711_v7 = vsel %vm3364_vm0, 4294967295, %v4710_v7  ;;  %1545 = vmatpush1.bf16.msk.msra.mxu0 %vm3364_vm0, %v4653_v2  ;;  %vm493_vm7 = vmand %vm4713_vm3, %vm4712_vm2  ;;  %vm4719_vm2 = vcmp.ge.s32.totalorder %v2511_v49, %v2306_v13  ;;  %vm4720_vm0 = vcmp.lt.s32.totalorder %v2511_v49, %v2343_v20 }
  0xc8   : > { %vm501_vm12 = vmand %vm4715_vm6, %vm4714_vm14  ;;  %vm4721_vm14 = vcmp.ge.s32.totalorder %v2511_v49, %v2311_v15 }
  0xc9   : > { %vm3383_vm4 = vmpackc.low %vm501_vm12, %vm493_vm7  ;;  %vm4724_vm12 = vcmp.lt.s32.totalorder %v2524_v51, %v2333_v19 }
  0xca   : > { %v4717_v60 = vsel %vm3383_vm4, 4294967295, %v4716_v60  ;;  %1577 = vmatpush1.bf16.msk.msra.mxu1 %vm3383_vm4, %v4653_v2  ;;  %vm508_vm3 = vmand %vm4719_vm2, %vm4718_vm13  ;;  %vm4725_vm13 = vcmp.ge.s32.totalorder %v2524_v51, %v2306_v13  ;;  %vm4726_vm4 = vcmp.lt.s32.totalorder %v2524_v51, %v2343_v20 }
  0xcb   : > { %vm516_vm7 = vmand %vm4721_vm14, %vm4720_vm0  ;;  %vm4727_vm0 = vcmp.ge.s32.totalorder %v2524_v51, %v2311_v15 }
  0xcc   : > { %vm3402_vm6 = vmpackc.low %vm516_vm7, %vm508_vm3  ;;  %vm4730_vm7 = vcmp.lt.s32.totalorder %v2677_v22, %v2333_v19 }
  0xcd   : > { %v4723_v6 = vsel %vm3402_vm6, 4294967295, %v4722_v6  ;;  %1547 = vmatprep.subr.msk.bf16.mxu0 %vm3402_vm6, %v4653_v2  ;;  %vm510_vm2 = vmand %vm4725_vm13, %vm4724_vm12  ;;  %vm4731_vm12 = vcmp.ge.s32.totalorder %v2677_v22, %v2306_v13  ;;  %vm4732_vm6 = vcmp.lt.s32.totalorder %v2677_v22, %v2343_v20 }
  0xce   : > { %vm518_vm3 = vmand %vm4727_vm0, %vm4726_vm4  ;;  %vm4733_vm4 = vcmp.ge.s32.totalorder %v2677_v22, %v2311_v15 }
  0xcf   : > { %vm3421_vm14 = vmpackc.low %vm518_vm3, %vm510_vm2  ;;  %vm4736_vm3 = vcmp.lt.s32.totalorder %v2680_v23, %v2333_v19  ;;  %v4758_v19 = vmov 0 }
  0xd0   : > { %v4729_v8 = vsel %vm3421_vm14, 4294967295, %v4728_v8  ;;  %1579 = vmatprep.subr.msk.bf16.mxu1 %vm3421_vm14, %v4653_v2  ;;  %vm507_vm13 = vmand %vm4731_vm12, %vm4730_vm7  ;;  %vm4737_vm7 = vcmp.ge.s32.totalorder %v2680_v23, %v2306_v13  ;;  %vm4738_vm14 = vcmp.lt.s32.totalorder %v2680_v23, %v2343_v20  ;;  %v4746_v13 = vmov 0 }
  0xd1   : > { %vm515_vm2 = vmand %vm4733_vm4, %vm4732_vm6  ;;  %vm4739_vm6 = vcmp.ge.s32.totalorder %v2680_v23, %v2311_v15  ;;  %v4752_v15 = vmov 0  ;;  %v4764_v20 = vmov 0 }
  0xd2   : > { %vm3440_vm0 = vmpackc.low %vm515_vm2, %vm507_vm13  ;;  %vm4742_vm2 = vcmp.lt.s32.totalorder %v2511_v49, %v2405_v29 }
  0xd3   : > { %v4735_v9 = vsel %vm3440_vm0, 4294967295, %v4734_v9  ;;  %1549 = vmatpush1.bf16.msk.msra.mxu0 %vm3440_vm0, %v4653_v2  ;;  %vm509_vm12 = vmand %vm4737_vm7, %vm4736_vm3  ;;  %vm4743_vm3 = vcmp.ge.s32.totalorder %v2511_v49, %v2381_v25  ;;  %vm4744_vm0 = vcmp.lt.s32.totalorder %v2511_v49, %v2415_v30 }
  0xd4   : > { %vm517_vm13 = vmand %vm4739_vm6, %vm4738_vm14  ;;  %vm4745_vm14 = vcmp.ge.s32.totalorder %v2511_v49, %v2387_v27 }
  0xd5   : > { %vm3459_vm4 = vmpackc.low %vm517_vm13, %vm509_vm12  ;;  %vm4748_vm13 = vcmp.lt.s32.totalorder %v2524_v51, %v2405_v29 }
  0xd6   : > { %v4741_v12 = vsel %vm3459_vm4, 4294967295, %v4740_v12  ;;  %1581 = vmatpush1.bf16.msk.msra.mxu1 %vm3459_vm4, %v4653_v2  ;;  %vm524_vm7 = vmand %vm4743_vm3, %vm4742_vm2  ;;  %vm4749_vm2 = vcmp.ge.s32.totalorder %v2524_v51, %v2381_v25  ;;  %vm4750_vm4 = vcmp.lt.s32.totalorder %v2524_v51, %v2415_v30 }
  0xd7   : > { %vm532_vm12 = vmand %vm4745_vm14, %vm4744_vm0  ;;  %vm4751_vm0 = vcmp.ge.s32.totalorder %v2524_v51, %v2387_v27 }
  0xd8   : > { %vm3478_vm6 = vmpackc.low %vm532_vm12, %vm524_vm7  ;;  %vm4754_vm12 = vcmp.lt.s32.totalorder %v2677_v22, %v2405_v29 }
  0xd9   : > { %v4747_v13 = vsel %vm3478_vm6, 4294967295, %v4746_v13  ;;  %1551 = vmatprep.subr.msk.bf16.mxu0 %vm3478_vm6, %v4653_v2  ;;  %vm526_vm3 = vmand %vm4749_vm2, %vm4748_vm13  ;;  %vm4755_vm13 = vcmp.ge.s32.totalorder %v2677_v22, %v2381_v25  ;;  %vm4756_vm6 = vcmp.lt.s32.totalorder %v2677_v22, %v2415_v30 }
  0xda   : > { %vm534_vm7 = vmand %vm4751_vm0, %vm4750_vm4  ;;  %vm4757_vm4 = vcmp.ge.s32.totalorder %v2677_v22, %v2387_v27 }
  0xdb   : > { %vm3497_vm14 = vmpackc.low %vm534_vm7, %vm526_vm3  ;;  %vm4760_vm7 = vcmp.lt.s32.totalorder %v2680_v23, %v2405_v29  ;;  %v4782_v29 = vmov 0 }
  0xdc   : > { %v4753_v15 = vsel %vm3497_vm14, 4294967295, %v4752_v15  ;;  %1583 = vmatprep.subr.msk.bf16.mxu1 %vm3497_vm14, %v4653_v2  ;;  %vm523_vm2 = vmand %vm4755_vm13, %vm4754_vm12  ;;  %vm4761_vm12 = vcmp.ge.s32.totalorder %v2680_v23, %v2381_v25  ;;  %vm4762_vm14 = vcmp.lt.s32.totalorder %v2680_v23, %v2415_v30  ;;  %v4770_v25 = vmov 0 }
  0xdd   : > { %vm531_vm3 = vmand %vm4757_vm4, %vm4756_vm6  ;;  %vm4763_vm6 = vcmp.ge.s32.totalorder %v2680_v23, %v2387_v27  ;;  %v4776_v27 = vmov 0  ;;  %v4788_v30 = vmov 0 }
  0xde   : > { %vm3516_vm0 = vmpackc.low %vm531_vm3, %vm523_vm2  ;;  %vm4766_vm3 = vcmp.lt.s32.totalorder %v2511_v49, %v2487_v43 }
  0xdf   : > { %v4759_v19 = vsel %vm3516_vm0, 4294967295, %v4758_v19  ;;  %1553 = vmatpush1.bf16.msk.msra.mxu0 %vm3516_vm0, %v4653_v2  ;;  %vm525_vm13 = vmand %vm4761_vm12, %vm4760_vm7  ;;  %vm4767_vm7 = vcmp.ge.s32.totalorder %v2511_v49, %v2453_v35  ;;  %vm4768_vm0 = vcmp.lt.s32.totalorder %v2511_v49, %v2490_v44 }
  0xe0   : > { %vm533_vm2 = vmand %vm4763_vm6, %vm4762_vm14  ;;  %vm4769_vm14 = vcmp.ge.s32.totalorder %v2511_v49, %v2455_v36 }
  0xe1   : > { %vm3535_vm4 = vmpackc.low %vm533_vm2, %vm525_vm13  ;;  %vm4772_vm2 = vcmp.lt.s32.totalorder %v2524_v51, %v2487_v43 }
  0xe2   : > { %v4765_v20 = vsel %vm3535_vm4, 4294967295, %v4764_v20  ;;  %1585 = vmatpush1.bf16.msk.msra.mxu1 %vm3535_vm4, %v4653_v2  ;;  %vm540_vm12 = vmand %vm4767_vm7, %vm4766_vm3  ;;  %vm4773_vm3 = vcmp.ge.s32.totalorder %v2524_v51, %v2453_v35  ;;  %vm4774_vm4 = vcmp.lt.s32.totalorder %v2524_v51, %v2490_v44 }
  0xe3   : > { %vm548_vm13 = vmand %vm4769_vm14, %vm4768_vm0  ;;  %vm4775_vm0 = vcmp.ge.s32.totalorder %v2524_v51, %v2455_v36 }
  0xe4   : > { %vm3554_vm6 = vmpackc.low %vm548_vm13, %vm540_vm12  ;;  %vm4778_vm13 = vcmp.lt.s32.totalorder %v2677_v22, %v2487_v43 }
  0xe5   : > { %v4771_v25 = vsel %vm3554_vm6, 4294967295, %v4770_v25  ;;  %1555 = vmatprep.subr.msk.bf16.mxu0 %vm3554_vm6, %v4653_v2  ;;  %vm542_vm7 = vmand %vm4773_vm3, %vm4772_vm2  ;;  %vm4779_vm2 = vcmp.ge.s32.totalorder %v2677_v22, %v2453_v35  ;;  %vm4780_vm6 = vcmp.lt.s32.totalorder %v2677_v22, %v2490_v44 }
  0xe6   : > { %vm550_vm12 = vmand %vm4775_vm0, %vm4774_vm4  ;;  %vm4781_vm4 = vcmp.ge.s32.totalorder %v2677_v22, %v2455_v36 }
  0xe7   : > { %vm3573_vm14 = vmpackc.low %vm550_vm12, %vm542_vm7  ;;  %vm4784_vm12 = vcmp.lt.s32.totalorder %v2680_v23, %v2487_v43  ;;  %v4806_v43 = vmov 0 }
  0xe8   : > { %v4777_v27 = vsel %vm3573_vm14, 4294967295, %v4776_v27  ;;  %1587 = vmatprep.subr.msk.bf16.mxu1 %vm3573_vm14, %v4653_v2  ;;  %vm539_vm3 = vmand %vm4779_vm2, %vm4778_vm13  ;;  %vm4785_vm13 = vcmp.ge.s32.totalorder %v2680_v23, %v2453_v35  ;;  %vm4786_vm14 = vcmp.lt.s32.totalorder %v2680_v23, %v2490_v44  ;;  %v4794_v35 = vmov 0 }
  0xe9   : > { %vm547_vm7 = vmand %vm4781_vm4, %vm4780_vm6  ;;  %vm4787_vm6 = vcmp.ge.s32.totalorder %v2680_v23, %v2455_v36  ;;  %v4800_v36 = vmov 0  ;;  %v4812_v44 = vmov 0 }
  0xea   : > { %vm3592_vm0 = vmpackc.low %vm547_vm7, %vm539_vm3  ;;  %vm4790_vm7 = vcmp.lt.s32.totalorder %v2511_v49, %v2554_v52 }
  0xeb   : > { %v4783_v29 = vsel %vm3592_vm0, 4294967295, %v4782_v29  ;;  %1557 = vmatpush1.bf16.msk.msra.mxu0 %vm3592_vm0, %v4653_v2  ;;  %vm541_vm2 = vmand %vm4785_vm13, %vm4784_vm12  ;;  %vm4791_vm12 = vcmp.ge.s32.totalorder %v2511_v49, %v2497_v45  ;;  %vm4792_vm0 = vcmp.lt.s32.totalorder %v2511_v49, %v2557_v53 }
  0xec   : > { %vm549_vm3 = vmand %vm4787_vm6, %vm4786_vm14  ;;  %vm4793_vm14 = vcmp.ge.s32.totalorder %v2511_v49, %v2499_v46 }
  0xed   : > { %vm3611_vm4 = vmpackc.low %vm549_vm3, %vm541_vm2  ;;  %vm4796_vm3 = vcmp.lt.s32.totalorder %v2524_v51, %v2554_v52 }
  0xee   : > { %v4789_v30 = vsel %vm3611_vm4, 4294967295, %v4788_v30  ;;  %1589 = vmatpush1.bf16.msk.msra.mxu1 %vm3611_vm4, %v4653_v2  ;;  %vm556_vm13 = vmand %vm4791_vm12, %vm4790_vm7  ;;  %vm4797_vm7 = vcmp.ge.s32.totalorder %v2524_v51, %v2497_v45  ;;  %vm4798_vm4 = vcmp.lt.s32.totalorder %v2524_v51, %v2557_v53 }
  0xef   : > { %vm564_vm2 = vmand %vm4793_vm14, %vm4792_vm0  ;;  %vm4799_vm0 = vcmp.ge.s32.totalorder %v2524_v51, %v2499_v46 }
  0xf0   : > { %vm3630_vm6 = vmpackc.low %vm564_vm2, %vm556_vm13  ;;  %vm4802_vm2 = vcmp.lt.s32.totalorder %v2677_v22, %v2554_v52 }
  0xf1   : > { %v4795_v35 = vsel %vm3630_vm6, 4294967295, %v4794_v35  ;;  %1559 = vmatprep.subr.msk.bf16.mxu0 %vm3630_vm6, %v4653_v2  ;;  %vm558_vm12 = vmand %vm4797_vm7, %vm4796_vm3  ;;  %vm4803_vm3 = vcmp.ge.s32.totalorder %v2677_v22, %v2497_v45  ;;  %vm4804_vm6 = vcmp.lt.s32.totalorder %v2677_v22, %v2557_v53 }
  0xf2   : > { %vm566_vm13 = vmand %vm4799_vm0, %vm4798_vm4  ;;  %vm4805_vm4 = vcmp.ge.s32.totalorder %v2677_v22, %v2499_v46 }
  0xf3   : > { %vm3649_vm14 = vmpackc.low %vm566_vm13, %vm558_vm12  ;;  %vm4808_vm13 = vcmp.lt.s32.totalorder %v2680_v23, %v2554_v52  ;;  %v4830_v52 = vmov 0 }
  0xf4   : > { %v4801_v36 = vsel %vm3649_vm14, 4294967295, %v4800_v36  ;;  %1591 = vmatprep.subr.msk.bf16.mxu1 %vm3649_vm14, %v4653_v2  ;;  %vm555_vm7 = vmand %vm4803_vm3, %vm4802_vm2  ;;  %vm4809_vm2 = vcmp.ge.s32.totalorder %v2680_v23, %v2497_v45  ;;  %vm4810_vm14 = vcmp.lt.s32.totalorder %v2680_v23, %v2557_v53  ;;  %v4818_v45 = vmov 0 }
  0xf5   : > { %vm563_vm12 = vmand %vm4805_vm4, %vm4804_vm6  ;;  %vm4811_vm6 = vcmp.ge.s32.totalorder %v2680_v23, %v2499_v46  ;;  %v4824_v46 = vmov 0  ;;  %v4836_v53 = vmov 0 }
  0xf6   : > { %vm3668_vm0 = vmpackc.low %vm563_vm12, %vm555_vm7  ;;  %vm4814_vm12 = vcmp.lt.s32.totalorder %v2511_v49, %v2641_v61 }
  0xf7   : > { %v4807_v43 = vsel %vm3668_vm0, 4294967295, %v4806_v43  ;;  %1561 = vmatpush1.bf16.msk.msra.mxu0 %vm3668_vm0, %v4653_v2  ;;  %vm557_vm3 = vmand %vm4809_vm2, %vm4808_vm13  ;;  %vm4815_vm13 = vcmp.ge.s32.totalorder %v2511_v49, %v2563_v55  ;;  %vm4816_vm0 = vcmp.lt.s32.totalorder %v2511_v49, %v2644_v62 }
  0xf8   : > { %vm565_vm7 = vmand %vm4811_vm6, %vm4810_vm14  ;;  %vm4817_vm14 = vcmp.ge.s32.totalorder %v2511_v49, %v2565_v56 }
  0xf9   : > { %vm3687_vm4 = vmpackc.low %vm565_vm7, %vm557_vm3  ;;  %vm4820_vm7 = vcmp.lt.s32.totalorder %v2524_v51, %v2641_v61 }
  0xfa   : > { %v4813_v44 = vsel %vm3687_vm4, 4294967295, %v4812_v44  ;;  %1593 = vmatpush1.bf16.msk.msra.mxu1 %vm3687_vm4, %v4653_v2  ;;  %vm572_vm2 = vmand %vm4815_vm13, %vm4814_vm12  ;;  %vm4821_vm12 = vcmp.ge.s32.totalorder %v2524_v51, %v2563_v55  ;;  %vm4822_vm4 = vcmp.lt.s32.totalorder %v2524_v51, %v2644_v62 }
  0xfb   : > { %vm580_vm3 = vmand %vm4817_vm14, %vm4816_vm0  ;;  %vm4823_vm0 = vcmp.ge.s32.totalorder %v2524_v51, %v2565_v56 }
  0xfc   : > { %vm3706_vm6 = vmpackc.low %vm580_vm3, %vm572_vm2  ;;  %vm4826_vm3 = vcmp.lt.s32.totalorder %v2677_v22, %v2641_v61 }
  0xfd   : > { %v4819_v45 = vsel %vm3706_vm6, 4294967295, %v4818_v45  ;;  %1563 = vmatprep.subr.msk.bf16.mxu0 %vm3706_vm6, %v4653_v2  ;;  %vm574_vm13 = vmand %vm4821_vm12, %vm4820_vm7  ;;  %vm4827_vm7 = vcmp.ge.s32.totalorder %v2677_v22, %v2563_v55  ;;  %vm4828_vm6 = vcmp.lt.s32.totalorder %v2677_v22, %v2644_v62 }
  0xfe   : > { %vm582_vm2 = vmand %vm4823_vm0, %vm4822_vm4  ;;  %vm4829_vm4 = vcmp.ge.s32.totalorder %v2677_v22, %v2565_v56 }
  0xff   : > { %vm3725_vm14 = vmpackc.low %vm582_vm2, %vm574_vm13  ;;  %vm4832_vm2 = vcmp.lt.s32.totalorder %v2680_v23, %v2641_v61  ;;  %v4854_v61 = vmov 0 }
 0x100   : > { %v4825_v46 = vsel %vm3725_vm14, 4294967295, %v4824_v46  ;;  %1595 = vmatprep.subr.msk.bf16.mxu1 %vm3725_vm14, %v4653_v2  ;;  %vm571_vm12 = vmand %vm4827_vm7, %vm4826_vm3  ;;  %vm4833_vm3 = vcmp.ge.s32.totalorder %v2680_v23, %v2563_v55  ;;  %vm4834_vm14 = vcmp.lt.s32.totalorder %v2680_v23, %v2644_v62  ;;  %v4842_v55 = vmov 0 }
 0x101   : > { %vm579_vm13 = vmand %vm4829_vm4, %vm4828_vm6  ;;  %vm4835_vm6 = vcmp.ge.s32.totalorder %v2680_v23, %v2565_v56  ;;  %v4848_v56 = vmov 0  ;;  %v4860_v62 = vmov 0 }
 0x102   : > { %vm3744_vm0 = vmpackc.low %vm579_vm13, %vm571_vm12  ;;  %vm4838_vm13 = vcmp.lt.s32.totalorder %v2511_v49, %v2656_v4 }
 0x103   : > { %v4831_v52 = vsel %vm3744_vm0, 4294967295, %v4830_v52  ;;  %1565 = vmatpush1.bf16.msk.msra.mxu0 %vm3744_vm0, %v4653_v2  ;;  %vm573_vm7 = vmand %vm4833_vm3, %vm4832_vm2  ;;  %vm4839_vm2 = vcmp.ge.s32.totalorder %v2511_v49, %v2598_v57  ;;  %vm4840_vm0 = vcmp.lt.s32.totalorder %v2511_v49, %v2659_v10 }
 0x104   : > { %vm581_vm12 = vmand %vm4835_vm6, %vm4834_vm14  ;;  %vm4841_vm14 = vcmp.ge.s32.totalorder %v2511_v49, %v2600_v58 }
 0x105   : > { %vm3763_vm4 = vmpackc.low %vm581_vm12, %vm573_vm7  ;;  %vm4844_vm12 = vcmp.lt.s32.totalorder %v2524_v51, %v2656_v4 }
 0x106   : > { %v4837_v53 = vsel %vm3763_vm4, 4294967295, %v4836_v53  ;;  %1597 = vmatpush1.bf16.msk.msra.mxu1 %vm3763_vm4, %v4653_v2  ;;  %vm588_vm3 = vmand %vm4839_vm2, %vm4838_vm13  ;;  %vm4845_vm13 = vcmp.ge.s32.totalorder %v2524_v51, %v2598_v57  ;;  %vm4846_vm4 = vcmp.lt.s32.totalorder %v2524_v51, %v2659_v10 }
 0x107   : > { %vm596_vm7 = vmand %vm4841_vm14, %vm4840_vm0  ;;  %vm4847_vm0 = vcmp.ge.s32.totalorder %v2524_v51, %v2600_v58 }
 0x108   : > { %vm3782_vm6 = vmpackc.low %vm596_vm7, %vm588_vm3  ;;  %vm4850_vm7 = vcmp.lt.s32.totalorder %v2677_v22, %v2656_v4 }
 0x109   : > { %v4843_v55 = vsel %vm3782_vm6, 4294967295, %v4842_v55  ;;  %1567 = vmatprep.subr.msk.bf16.mxu0 %vm3782_vm6, %v4653_v2  ;;  %vm590_vm2 = vmand %vm4845_vm13, %vm4844_vm12  ;;  %vm4851_vm12 = vcmp.ge.s32.totalorder %v2677_v22, %v2598_v57  ;;  %vm4852_vm6 = vcmp.lt.s32.totalorder %v2677_v22, %v2659_v10 }
 0x10a   : > { %vm598_vm3 = vmand %vm4847_vm0, %vm4846_vm4  ;;  %vm4853_vm4 = vcmp.ge.s32.totalorder %v2677_v22, %v2600_v58 }
 0x10b   : > { %vm3801_vm14 = vmpackc.low %vm598_vm3, %vm590_vm2  ;;  %vm4856_vm3 = vcmp.lt.s32.totalorder %v2680_v23, %v2656_v4  ;;  %v4901_v4 = vld [vmem:[#allocation13_spill] sm:$0xff] }
 0x10c   : > { %v4849_v56 = vsel %vm3801_vm14, 4294967295, %v4848_v56  ;;  %1599 = vmatprep.subr.msk.bf16.mxu1 %vm3801_vm14, %v4653_v2  ;;  %vm587_vm13 = vmand %vm4851_vm12, %vm4850_vm7  ;;  %vm4857_vm7 = vcmp.ge.s32.totalorder %v2680_v23, %v2598_v57  ;;  %vm4858_vm14 = vcmp.lt.s32.totalorder %v2680_v23, %v2659_v10  ;;  %v4866_v57 = vmov 0  ;;  %v4903_v10 = vld [vmem:[#allocation12_spill] sm:$0xff] }
 0x10d   : > { %vm595_vm2 = vmand %vm4853_vm4, %vm4852_vm6  ;;  %vm4859_vm6 = vcmp.ge.s32.totalorder %v2680_v23, %v2600_v58  ;;  %v4884_v58 = vmov 0 }
 0x10e   : > { %vm3820_vm0 = vmpackc.low %vm595_vm2, %vm587_vm13  ;;  %vm4862_vm2 = vcmp.lt.s32.totalorder %v2511_v49, %v2746_v38 }
 0x10f   : > { %v4855_v61 = vsel %vm3820_vm0, 4294967295, %v4854_v61  ;;  %1569 = vmatpush1.bf16.msk.msra.mxu0 %vm3820_vm0, %v4653_v2  ;;  %vm589_vm12 = vmand %vm4857_vm7, %vm4856_vm3  ;;  %vm4863_vm3 = vcmp.ge.s32.totalorder %v2511_v49, %v2674_v11  ;;  %vm4864_vm0 = vcmp.lt.s32.totalorder %v2511_v49, %v2780_v40 }
 0x110   : > { %vm597_vm13 = vmand %vm4859_vm6, %vm4858_vm14  ;;  %vm4865_vm14 = vcmp.ge.s32.totalorder %v2511_v49, %v2710_v33  ;;  %v4872_v49 = vmov 0 }
 0x111   : > { %vm3839_vm4 = vmpackc.low %vm597_vm13, %vm589_vm12  ;;  %vm4868_vm13 = vcmp.lt.s32.totalorder %v2524_v51, %v2746_v38 }
 0x112   : > { %v4861_v62 = vsel %vm3839_vm4, 4294967295, %v4860_v62  ;;  %1601 = vmatpush1.bf16.msk.msra.mxu1 %vm3839_vm4, %v4653_v2  ;;  %vm604_vm7 = vmand %vm4863_vm3, %vm4862_vm2  ;;  %vm4869_vm2 = vcmp.ge.s32.totalorder %v2524_v51, %v2674_v11  ;;  %vm4870_vm4 = vcmp.lt.s32.totalorder %v2524_v51, %v2780_v40 }
 0x113   : > { %vm612_vm12 = vmand %vm4865_vm14, %vm4864_vm0  ;;  %vm4871_vm0 = vcmp.ge.s32.totalorder %v2524_v51, %v2710_v33 }
 0x114   : > { %vm3858_vm6 = vmpackc.low %vm612_vm12, %vm604_vm7  ;;  %vm4874_vm12 = vcmp.lt.s32.totalorder %v2677_v22, %v2746_v38 }
 0x115   : > { %v4867_v57 = vsel %vm3858_vm6, 4294967295, %v4866_v57  ;;  %1571 = vmatprep.subr.msk.bf16.mxu0 %vm3858_vm6, %v4653_v2  ;;  %vm606_vm3 = vmand %vm4869_vm2, %vm4868_vm13  ;;  %vm4875_vm13 = vcmp.ge.s32.totalorder %v2677_v22, %v2674_v11  ;;  %vm4876_vm6 = vcmp.lt.s32.totalorder %v2677_v22, %v2780_v40 }
 0x116   : > { %vm614_vm7 = vmand %vm4871_vm0, %vm4870_vm4  ;;  %vm4877_vm4 = vcmp.ge.s32.totalorder %v2677_v22, %v2710_v33  ;;  %v4907_v22 = vld [vmem:[#allocation15_spill] sm:$0xff] }
 0x117   : > { %vm3877_vm14 = vmpackc.low %vm614_vm7, %vm606_vm3  ;;  %vm4880_vm7 = vcmp.lt.s32.totalorder %v2680_v23, %v2746_v38  ;;  %v4913_v38 = vld [vmem:[#allocation18_spill] sm:$0xff] }
 0x118   : > { %v4873_v49 = vsel %vm3877_vm14, 4294967295, %v4872_v49  ;;  %1603 = vmatprep.subr.msk.bf16.mxu1 %vm3877_vm14, %v4653_v2  ;;  %vm603_vm2 = vmand %vm4875_vm13, %vm4874_vm12  ;;  %vm4881_vm12 = vcmp.ge.s32.totalorder %v2680_v23, %v2674_v11  ;;  %vm4882_vm14 = vcmp.lt.s32.totalorder %v2680_v23, %v2780_v40  ;;  %v4905_v11 = vld [vmem:[#allocation14_spill] sm:$0xff]  ;;  %v4915_v40 = vld [vmem:[#allocation19_spill] sm:$0xff] }
 0x119   : > { %vm611_vm3 = vmand %vm4877_vm4, %vm4876_vm6  ;;  %vm4883_vm6 = vcmp.ge.s32.totalorder %v2680_v23, %v2710_v33  ;;  %v4909_v23 = vld [vmem:[#allocation17_spill] sm:$0xff]  ;;  %v4911_v33 = vld [vmem:[#allocation16_spill] sm:$0xff] }
 0x11a   : > { %vm3896_vm0 = vmpackc.low %vm611_vm3, %vm603_vm2  ;;  %vm4887_vm3 = vnez %v4570_v28 }
 0x11b   : > { %1573 = vmatpush1.bf16.msk.msra.mxu0 %vm3896_vm0, %v4653_v2  ;;  %vm605_vm13 = vmand %vm4881_vm12, %vm4880_vm7  ;;  %vm4888_vm7 = vnez %v4572_v31  ;;  %vm4889_vm12 = vnez %v4576_v37 }
 0x11c   : > { %vm613_vm2 = vmand %vm4883_vm6, %vm4882_vm14  ;;  %1607 = vmatprep.subr.msk.bf16.mxu0 %vm2313_vm11, %v4653_v2  ;;  %vm4886_vm14 = vnez %v4566_v24  ;;  %vm4891_vm6 = vnez %v4578_v42 }
 0x11d   : > { %vm3918_vm4 = vmpackc.low %vm613_vm2, %vm605_vm13  ;;  %vm4890_vm13 = vnez %v4574_v34  ;;  %vm4892_vm2 = vnez %v4580_v50 }
 0x11e   : > { %v4885_v58 = vsel %vm3918_vm4, 4294967295, %v4884_v58  ;;  %1605 = vmatpush1.bf16.msk.msra.mxu1 %vm3918_vm4, %v4653_v2  ;;  %930 = vmatmul.mubr.bf16.vlgmr.msra.gmra.mrb[4].mxu0 %v3298_v3 }
 0x11f   : > { %1639 = vmatprep.subr.msk.bf16.mxu1 %vm2328_vm1, %v4653_v2  ;;  %1609 = vmatpush1.bf16.msk.msra.mxu0 %vm2349_vm8, %v4653_v2 }
 0x120   : > { %1611 = vmatprep.subr.msk.bf16.mxu0 %vm2383_vm9, %v4653_v2  ;;  %1011 = vmatprep.mubr.bf16.mxu0 %v4695_v14 }
 0x121   : > { %971 = vmatmul.mubr.bf16.vlgmr.msra.gmra.mrb[4].mxu1 %v3298_v3 }
 0x122   : > { %1641 = vmatpush1.bf16.msk.msra.mxu1 %vm4886_vm14, %v4653_v2  ;;  %1052 = vmatprep.mubr.bf16.mxu1 %v4695_v14 }
 0x123   : > { %1643 = vmatprep.subr.msk.bf16.mxu1 %vm4887_vm3, %v4653_v2  ;;  %1613 = vmatpush1.bf16.msk.msra.mxu0 %vm4888_vm7, %v4653_v2  ;;  %vm4893_vm3 = vnez %v4588_v59  ;;  %vm4894_vm7 = vnez %v4584_v54 }
 0x124   : > { %1615 = vmatprep.subr.msk.bf16.mxu0 %vm4889_vm12, %v4653_v2  ;;  %vm4895_vm12 = vnez %v4594_v0 }
 0x126   : > { %1645 = vmatpush1.bf16.msk.msra.mxu1 %vm4890_vm13, %v4653_v2  ;;  %vm4896_vm13 = vnez %v4600_v32 }
 0x127   : > { %1647 = vmatprep.subr.msk.bf16.mxu1 %vm4891_vm6, %v4653_v2  ;;  %1617 = vmatpush1.bf16.msk.msra.mxu0 %vm4892_vm2, %v4653_v2  ;;  %vm4897_vm6 = vnez %v4612_v41  ;;  %vm4898_vm2 = vnez %v4606_v39 }
 0x128   : > { %1619 = vmatprep.subr.msk.bf16.mxu0 %vm4893_vm3, %v4653_v2  ;;  %vm4899_vm3 = vnez %v4618_v47 }
 0x12a   : > { %1649 = vmatpush1.bf16.msk.msra.mxu1 %vm4894_vm7, %v4653_v2  ;;  %vm4900_vm7 = vnez %v4624_v48 }
 0x12b   : > { %1651 = vmatprep.subr.msk.bf16.mxu1 %vm4895_vm12, %v4653_v2  ;;  %1621 = vmatpush1.bf16.msk.msra.mxu0 %vm4896_vm13, %v4653_v2  ;;  %vm4902_vm12 = vnez %v4901_v4  ;;  %vm4904_vm13 = vnez %v4903_v10 }
 0x12c   : > { %1623 = vmatprep.subr.msk.bf16.mxu0 %vm4897_vm6, %v4653_v2  ;;  %vm4906_vm6 = vnez %v4905_v11 }
 0x12e   : > { %1653 = vmatpush1.bf16.msk.msra.mxu1 %vm4898_vm2, %v4653_v2  ;;  %vm4908_vm2 = vnez %v4907_v22 }
 0x12f   : > { %1655 = vmatprep.subr.msk.bf16.mxu1 %vm4899_vm3, %v4653_v2  ;;  %1625 = vmatpush1.bf16.msk.msra.mxu0 %vm4900_vm7, %v4653_v2  ;;  %vm4910_vm3 = vnez %v4909_v23  ;;  %vm4912_vm7 = vnez %v4911_v33 }
 0x130   : > { %1627 = vmatprep.subr.msk.bf16.mxu0 %vm4902_vm12, %v4653_v2  ;;  %vm4914_vm12 = vnez %v4913_v38  ;;  %v4919_v38 = vld [vmem:[#allocation25_spill] sm:$0xff] }
 0x132   : > { %1657 = vmatpush1.bf16.msk.msra.mxu1 %vm4904_vm13, %v4653_v2  ;;  %vm4916_vm13 = vnez %v4915_v40  ;;  %v4920_v40 = vld [vmem:[#allocation24_spill] sm:$0xff] }
 0x133   : > { %1659 = vmatprep.subr.msk.bf16.mxu1 %vm4906_vm6, %v4653_v2  ;;  %1629 = vmatpush1.bf16.msk.msra.mxu0 %vm4908_vm2, %v4653_v2  ;;  %vm4917_vm6 = vnez %v4681_v5  ;;  %vm4918_vm2 = vnez %v4678_v63  ;;  %v4922_v5 = vld [vmem:[#allocation20_spill] sm:$0xff]  ;;  %v4923_v63 = vld [vmem:[#allocation26_spill] sm:$0xff] }
 0x134   : > { %1631 = vmatprep.subr.msk.bf16.mxu0 %vm4910_vm3, %v4653_v2 }
 0x136   : > { %1661 = vmatpush1.bf16.msk.msra.mxu1 %vm4912_vm7, %v4653_v2 }
 0x137   : > { %1663 = vmatprep.subr.msk.bf16.mxu1 %vm4914_vm12, %v4653_v2  ;;  %1633 = vmatpush1.bf16.msk.msra.mxu0 %vm4916_vm13, %v4653_v2  ;;  %vm4921_vm13 = vnez %v4920_v40 }
 0x138   : > { %1635 = vmatprep.subr.msk.bf16.mxu0 %vm4917_vm6, %v4653_v2  ;;  %vm4933_vm6 = vnez %v4759_v19 }
 0x13a   : > { %1665 = vmatpush1.bf16.msk.msra.mxu1 %vm4918_vm2, %v4653_v2  ;;  %vm4924_vm2 = vnez %v4923_v63 }
 0x13b   : > { %1667 = vmatprep.subr.msk.bf16.mxu1 %vm3277_vm15, %v4653_v2  ;;  %1637 = vmatpush1.bf16.msk.msra.mxu0 %vm3292_vm5, %v4653_v2  ;;  %vm4925_vm15 = vnez %v4711_v7  ;;  %vm4926_vm5 = vnez %v4723_v6 }
 0x13c   : > { %1671 = vmatprep.subr.msk.bf16.mxu0 %vm3324_vm10, %v4653_v2  ;;  %vm4931_vm10 = vnez %v4741_v12 }
 0x13e   : > { %1669 = vmatpush1.bf16.msk.msra.mxu1 %vm4921_vm13, %v4653_v2  ;;  %1012 = vmatmul.mubr.bf16.vlgmr.msra.gmra.mrb[0].mxu0 %v4922_v5  ;;  %vm4927_vm13 = vnez %v4717_v60 }
 0x13f   : > { %1703 = vmatprep.subr.msk.bf16.mxu1 %vm4924_vm2, %v4653_v2  ;;  %1673 = vmatpush1.bf16.msk.msra.mxu0 %vm4925_vm15, %v4653_v2  ;;  %vm4928_vm2 = vnez %v4729_v8  ;;  %vm4929_vm15 = vnez %v4735_v9 }
 0x140   : > { %1675 = vmatprep.subr.msk.bf16.mxu0 %vm4926_vm5, %v4653_v2  ;;  %1093 = vmatprep.mubr.bf16.mxu0 %v4695_v14  ;;  %vm4930_vm5 = vnez %v4747_v13 }
 0x141   : > { %1053 = vmatmul.mubr.bf16.vlgmr.msra.gmra.mrb[0].mxu1 %v4922_v5 }
 0x142   : > { %1705 = vmatpush1.bf16.msk.msra.mxu1 %vm4927_vm13, %v4653_v2  ;;  %1134 = vmatprep.mubr.bf16.mxu1 %v4695_v14  ;;  %vm4932_vm13 = vnez %v4753_v15 }
 0x143   : > { %1707 = vmatprep.subr.msk.bf16.mxu1 %vm4928_vm2, %v4653_v2  ;;  %1677 = vmatpush1.bf16.msk.msra.mxu0 %vm4929_vm15, %v4653_v2  ;;  %vm4934_vm2 = vnez %v4771_v25  ;;  %vm4935_vm15 = vnez %v4765_v20 }
 0x144   : > { %1679 = vmatprep.subr.msk.bf16.mxu0 %vm4930_vm5, %v4653_v2  ;;  %vm4936_vm5 = vnez %v4777_v27 }
 0x146   : > { %1709 = vmatpush1.bf16.msk.msra.mxu1 %vm4931_vm10, %v4653_v2  ;;  %vm4937_vm10 = vnez %v4783_v29 }
 0x147   : > { %1711 = vmatprep.subr.msk.bf16.mxu1 %vm4932_vm13, %v4653_v2  ;;  %1681 = vmatpush1.bf16.msk.msra.mxu0 %vm4933_vm6, %v4653_v2  ;;  %vm4938_vm13 = vnez %v4795_v35  ;;  %vm4939_vm6 = vnez %v4789_v30 }
 0x148   : > { %1683 = vmatprep.subr.msk.bf16.mxu0 %vm4934_vm2, %v4653_v2  ;;  %vm4940_vm2 = vnez %v4801_v36 }
 0x14a   : > { %1713 = vmatpush1.bf16.msk.msra.mxu1 %vm4935_vm15, %v4653_v2  ;;  %vm4941_vm15 = vnez %v4807_v43 }
 0x14b   : > { %1715 = vmatprep.subr.msk.bf16.mxu1 %vm4936_vm5, %v4653_v2  ;;  %1685 = vmatpush1.bf16.msk.msra.mxu0 %vm4937_vm10, %v4653_v2  ;;  %vm4942_vm5 = vnez %v4819_v45  ;;  %vm4943_vm10 = vnez %v4813_v44 }
 0x14c   : > { %1687 = vmatprep.subr.msk.bf16.mxu0 %vm4938_vm13, %v4653_v2  ;;  %vm4944_vm13 = vnez %v4825_v46 }
 0x14e   : > { %1717 = vmatpush1.bf16.msk.msra.mxu1 %vm4939_vm6, %v4653_v2  ;;  %vm4945_vm6 = vnez %v4831_v52 }
 0x14f   : > { %1719 = vmatprep.subr.msk.bf16.mxu1 %vm4940_vm2, %v4653_v2  ;;  %1689 = vmatpush1.bf16.msk.msra.mxu0 %vm4941_vm15, %v4653_v2  ;;  %vm4946_vm2 = vnez %v4843_v55  ;;  %vm4947_vm15 = vnez %v4837_v53 }
 0x150   : > { %1691 = vmatprep.subr.msk.bf16.mxu0 %vm4942_vm5, %v4653_v2  ;;  %vm4948_vm5 = vnez %v4849_v56 }
 0x152   : > { %1721 = vmatpush1.bf16.msk.msra.mxu1 %vm4943_vm10, %v4653_v2  ;;  %vm4949_vm10 = vnez %v4855_v61 }
 0x153   : > { %1723 = vmatprep.subr.msk.bf16.mxu1 %vm4944_vm13, %v4653_v2  ;;  %1693 = vmatpush1.bf16.msk.msra.mxu0 %vm4945_vm6, %v4653_v2  ;;  %vm4950_vm13 = vnez %v4867_v57  ;;  %vm4951_vm6 = vnez %v4861_v62 }
 0x154   : > { %1695 = vmatprep.subr.msk.bf16.mxu0 %vm4946_vm2, %v4653_v2  ;;  %vm4952_vm2 = vnez %v4873_v49 }
 0x156   : > { %1725 = vmatpush1.bf16.msk.msra.mxu1 %vm4947_vm15, %v4653_v2 }
 0x157   : > { %1727 = vmatprep.subr.msk.bf16.mxu1 %vm4948_vm5, %v4653_v2  ;;  %1697 = vmatpush1.bf16.msk.msra.mxu0 %vm4949_vm10, %v4653_v2 }
 0x158   : > { %1699 = vmatprep.subr.msk.bf16.mxu0 %vm4950_vm13, %v4653_v2 }
 0x15a   : > { %1729 = vmatpush1.bf16.msk.msra.mxu1 %vm4951_vm6, %v4653_v2 }
 0x15b   : > { %1731 = vmatprep.subr.msk.bf16.mxu1 %vm4952_vm2, %v4653_v2  ;;  %1701 = vmatpush1.bf16.msk.msra.mxu0 %vm3896_vm0, %v4653_v2 }
 0x15c   : > { %1735 = vmatprep.subr.msk.bf16.mxu0 %vm2313_vm11, %v4653_v2  ;;  %vm4953_vm11 = vnez %v4570_v28  ;;  %v4975_v28 = vld [vmem:[#allocation22_spill] sm:$0xff] }
 0x15e   : > { %1733 = vmatpush1.bf16.msk.msra.mxu1 %vm3918_vm4, %v4653_v2  ;;  %1094 = vmatmul.mubr.bf16.vlgmr.msra.gmra.mrb[4].mxu0 %v4922_v5  ;;  %vm4958_vm4 = vnez %v4580_v50 }
 0x15f   : > { %1767 = vmatprep.subr.msk.bf16.mxu1 %vm2328_vm1, %v4653_v2  ;;  %1737 = vmatpush1.bf16.msk.msra.mxu0 %vm2349_vm8, %v4653_v2  ;;  %vm4954_vm1 = vnez %v4572_v31  ;;  %vm4955_vm8 = vnez %v4576_v37  ;;  %v4977_v31 = vld [vmem:[#allocation21_spill] sm:$0xff] }
 0x160   : > { %1739 = vmatprep.subr.msk.bf16.mxu0 %vm2383_vm9, %v4653_v2  ;;  %1175 = vmatprep.mubr.bf16.mxu0 %v4695_v14  ;;  %vm4956_vm9 = vnez %v4574_v34  ;;  %v814_v34 = vpack.c.bf16 %v813_v21, %v813_v21 }
 0x161   : > { %1135 = vmatmul.mubr.bf16.vlgmr.msra.gmra.mrb[4].mxu1 %v4922_v5 }
 0x162   : > { %1769 = vmatpush1.bf16.msk.msra.mxu1 %vm4886_vm14, %v4653_v2  ;;  %1216 = vmatprep.mubr.bf16.mxu1 %v4695_v14  ;;  %vm4957_vm14 = vnez %v4578_v42  ;;  %v1315_v42 = vld [vmem:[#allocation5] sm:$0xff] }
 0x163   : > { %1771 = vmatprep.subr.msk.bf16.mxu1 %vm4953_vm11, %v4653_v2  ;;  %1741 = vmatpush1.bf16.msk.msra.mxu0 %vm4954_vm1, %v4653_v2  ;;  %vm4959_vm11 = vnez %v4588_v59  ;;  %vm4960_vm1 = vnez %v4584_v54 }
 0x164   : > { %1743 = vmatprep.subr.msk.bf16.mxu0 %vm4955_vm8, %v4653_v2  ;;  %vm4961_vm8 = vnez %v4594_v0 }
 0x166   : > { %1773 = vmatpush1.bf16.msk.msra.mxu1 %vm4956_vm9, %v4653_v2  ;;  %vm4962_vm9 = vnez %v4600_v32 }
 0x167   : > { %1775 = vmatprep.subr.msk.bf16.mxu1 %vm4957_vm14, %v4653_v2  ;;  %1745 = vmatpush1.bf16.msk.msra.mxu0 %vm4958_vm4, %v4653_v2  ;;  %vm4963_vm14 = vnez %v4612_v41  ;;  %vm4964_vm4 = vnez %v4606_v39 }
 0x168   : > { %1747 = vmatprep.subr.msk.bf16.mxu0 %vm4959_vm11, %v4653_v2  ;;  %vm4965_vm11 = vnez %v4618_v47 }
 0x16a   : > { %1777 = vmatpush1.bf16.msk.msra.mxu1 %vm4960_vm1, %v4653_v2  ;;  %vm4966_vm1 = vnez %v4624_v48 }
 0x16b   : > { %1779 = vmatprep.subr.msk.bf16.mxu1 %vm4961_vm8, %v4653_v2  ;;  %1749 = vmatpush1.bf16.msk.msra.mxu0 %vm4962_vm9, %v4653_v2  ;;  %vm4967_vm8 = vnez %v4901_v4  ;;  %vm4968_vm9 = vnez %v4903_v10 }
 0x16c   : > { %1751 = vmatprep.subr.msk.bf16.mxu0 %vm4963_vm14, %v4653_v2  ;;  %vm4969_vm14 = vnez %v4905_v11 }
 0x16e   : > { %1781 = vmatpush1.bf16.msk.msra.mxu1 %vm4964_vm4, %v4653_v2  ;;  %vm4970_vm4 = vnez %v4907_v22 }
 0x16f   : > { %1783 = vmatprep.subr.msk.bf16.mxu1 %vm4965_vm11, %v4653_v2  ;;  %1753 = vmatpush1.bf16.msk.msra.mxu0 %vm4966_vm1, %v4653_v2  ;;  %vm4974_vm11 = vnez %v4973_v26  ;;  %vm4976_vm1 = vnez %v4975_v28 }
 0x170   : > { %1755 = vmatprep.subr.msk.bf16.mxu0 %vm4967_vm8, %v4653_v2  ;;  %vm4981_vm8 = vnez %v4919_v38 }
 0x172   : > { %1785 = vmatpush1.bf16.msk.msra.mxu1 %vm4968_vm9, %v4653_v2  ;;  %vm4982_vm9 = vnez %v4920_v40 }
 0x173   : > { %1787 = vmatprep.subr.msk.bf16.mxu1 %vm4969_vm14, %v4653_v2  ;;  %1757 = vmatpush1.bf16.msk.msra.mxu0 %vm4970_vm4, %v4653_v2  ;;  %vm4983_vm14 = vnez %v4923_v63  ;;  %vm4984_vm4 = vnez %v4711_v7 }
 0x174   : > { %1759 = vmatprep.subr.msk.bf16.mxu0 %vm4910_vm3, %v4653_v2  ;;  %vm4978_vm3 = vnez %v4977_v31 }
 0x176   : > { %1789 = vmatpush1.bf16.msk.msra.mxu1 %vm4912_vm7, %v4653_v2  ;;  %vm4979_vm7 = vnez %v4685_v17  ;;  %v5007_v17 = vld [vmem:[#allocation11_spill] sm:$0xff] }
 0x177   : > { %1791 = vmatprep.subr.msk.bf16.mxu1 %vm4914_vm12, %v4653_v2  ;;  %1761 = vmatpush1.bf16.msk.msra.mxu0 %vm4974_vm11, %v4653_v2  ;;  %vm4980_vm12 = vnez %v4687_v1  ;;  %vm4985_vm11 = vnez %v4723_v6  ;;  %v1319_v37 = vsub.s32 0, %v5007_v17  ;;  %v1323_v50 = vsub.s32 1, %v5007_v17 }
 0x178   : > { %1763 = vmatprep.subr.msk.bf16.mxu0 %vm4976_vm1, %v4653_v2  ;;  %vm4986_vm1 = vnez %v4717_v60  ;;  %v1327_v54 = vsub.s32 2, %v5007_v17  ;;  %v1331_v0 = vsub.s32 3, %v5007_v17 }
 0x179   : > { %v1320_v59 = vrot.slane %v1315_v42, %v1319_v37  ;;  %v1324_v32 = vrot.slane %v1315_v42, %v1323_v50 }
 0x17a   : > { %1793 = vmatpush1.bf16.msk.msra.mxu1 %vm4978_vm3, %v4653_v2  ;;  %vm4987_vm3 = vnez %v4729_v8  ;;  %v1328_v41 = vrot.slane %v1315_v42, %v1327_v54  ;;  %v1332_v63 = vrot.slane %v1315_v42, %v1331_v0 }
 0x17b   : > { %1795 = vmatprep.subr.msk.bf16.mxu1 %vm4979_vm7, %v4653_v2  ;;  %1765 = vmatpush1.bf16.msk.msra.mxu0 %vm4980_vm12, %v4653_v2  ;;  %vm4988_vm7 = vnez %v4735_v9  ;;  %vm4989_vm12 = vnez %v4747_v13  ;;  %v1335_v9 = vsub.s32 4, %v5007_v17  ;;  %v1343_v13 = vsub.s32 6, %v5007_v17 }
 0x17c   : > { %1799 = vmatprep.subr.msk.bf16.mxu0 %vm4981_vm8, %v4653_v2  ;;  %vm4990_vm8 = vnez %v4741_v12  ;;  %v1339_v12 = vsub.s32 5, %v5007_v17 }
 0x17e   : > { %1797 = vmatpush1.bf16.msk.msra.mxu1 %vm4982_vm9, %v4653_v2  ;;  %1176 = vmatmul.mubr.bf16.vlgmr.msra.gmra.mrb[0].mxu0 %v814_v34  ;;  %vm4991_vm9 = vnez %v4753_v15  ;;  %v1336_v15 = vrot.slane %v1315_v42, %v1335_v9 }
 0x17f   : > { %1831 = vmatprep.subr.msk.bf16.mxu1 %vm4983_vm14, %v4653_v2  ;;  %1801 = vmatpush1.bf16.msk.msra.mxu0 %vm4984_vm4, %v4653_v2  ;;  %vm4992_vm14 = vnez %v4759_v19  ;;  %vm4993_vm4 = vnez %v4771_v25  ;;  %v1347_v19 = vsub.s32 7, %v5007_v17 }
 0x180   : > { %1803 = vmatprep.subr.msk.bf16.mxu0 %vm4985_vm11, %v4653_v2  ;;  %1257 = vmatprep.mubr.bf16.mxu0 %v4695_v14  ;;  %vm4994_vm11 = vnez %v4765_v20  ;;  %v1340_v20 = vrot.slane %v1315_v42, %v1339_v12 }
 0x181   : > { %1217 = vmatmul.mubr.bf16.vlgmr.msra.gmra.mrb[0].mxu1 %v814_v34 }
 0x182   : > { %1833 = vmatpush1.bf16.msk.msra.mxu1 %vm4986_vm1, %v4653_v2  ;;  %1298 = vmatprep.mubr.bf16.mxu1 %v4695_v14  ;;  %vm4995_vm1 = vnez %v4777_v27  ;;  %v1344_v27 = vrot.slane %v1315_v42, %v1343_v13 }
 0x183   : > { %1835 = vmatprep.subr.msk.bf16.mxu1 %vm4987_vm3, %v4653_v2  ;;  %1805 = vmatpush1.bf16.msk.msra.mxu0 %vm4988_vm7, %v4653_v2  ;;  %vm4996_vm3 = vnez %v4783_v29  ;;  %vm4997_vm7 = vnez %v4795_v35  ;;  %v1348_v35 = vrot.slane %v1315_v42, %v1347_v19 }
 0x184   : > { %1807 = vmatprep.subr.msk.bf16.mxu0 %vm4989_vm12, %v4653_v2  ;;  %vm4998_vm12 = vnez %v4789_v30 }
 0x186   : > { %1837 = vmatpush1.bf16.msk.msra.mxu1 %vm4990_vm8, %v4653_v2  ;;  %vm4999_vm8 = vnez %v4801_v36 }
 0x187   : > { %1839 = vmatprep.subr.msk.bf16.mxu1 %vm4991_vm9, %v4653_v2  ;;  %1809 = vmatpush1.bf16.msk.msra.mxu0 %vm4992_vm14, %v4653_v2  ;;  %vm5000_vm9 = vnez %v4807_v43  ;;  %vm5001_vm14 = vnez %v4819_v45 }
 0x188   : > { %1811 = vmatprep.subr.msk.bf16.mxu0 %vm4993_vm4, %v4653_v2  ;;  %vm5002_vm4 = vnez %v4813_v44 }
 0x18a   : > { %1841 = vmatpush1.bf16.msk.msra.mxu1 %vm4994_vm11, %v4653_v2  ;;  %vm5003_vm11 = vnez %v4825_v46 }
 0x18b   : > { %1843 = vmatprep.subr.msk.bf16.mxu1 %vm4995_vm1, %v4653_v2  ;;  %1813 = vmatpush1.bf16.msk.msra.mxu0 %vm4996_vm3, %v4653_v2  ;;  %vm5004_vm1 = vnez %v4831_v52  ;;  %vm5005_vm3 = vnez %v4843_v55 }
 0x18c   : > { %1815 = vmatprep.subr.msk.bf16.mxu0 %vm4997_vm7, %v4653_v2 }
 0x18e   : > { %1845 = vmatpush1.bf16.msk.msra.mxu1 %vm4998_vm12, %v4653_v2 }
 0x18f   : > { %1847 = vmatprep.subr.msk.bf16.mxu1 %vm4999_vm8, %v4653_v2  ;;  %1817 = vmatpush1.bf16.msk.msra.mxu0 %vm5000_vm9, %v4653_v2 }
 0x190   : > { %1819 = vmatprep.subr.msk.bf16.mxu0 %vm5001_vm14, %v4653_v2 }
 0x192   : > { %1849 = vmatpush1.bf16.msk.msra.mxu1 %vm5002_vm4, %v4653_v2 }
 0x193   : > { %1851 = vmatprep.subr.msk.bf16.mxu1 %vm5003_vm11, %v4653_v2  ;;  %1821 = vmatpush1.bf16.msk.msra.mxu0 %vm5004_vm1, %v4653_v2 }
 0x194   : > { %1823 = vmatprep.subr.msk.bf16.mxu0 %vm5005_vm3, %v4653_v2 }
 0x196   : > { %1853 = vmatpush1.bf16.msk.msra.mxu1 %vm4947_vm15, %v4653_v2  ;;  %vm5006_vm15 = vnez %v4885_v58 }
 0x197   : > { %1855 = vmatprep.subr.msk.bf16.mxu1 %vm4948_vm5, %v4653_v2  ;;  %1825 = vmatpush1.bf16.msk.msra.mxu0 %vm4949_vm10, %v4653_v2 }
 0x198   : > { %1827 = vmatprep.subr.msk.bf16.mxu0 %vm4950_vm13, %v4653_v2 }
 0x19a   : > { %1857 = vmatpush1.bf16.msk.msra.mxu1 %vm4951_vm6, %v4653_v2 }
 0x19b   : > { %1859 = vmatprep.subr.msk.bf16.mxu1 %vm4952_vm2, %v4653_v2  ;;  %1829 = vmatpush1.bf16.msk.msra.mxu0 %vm3896_vm0, %v4653_v2 }
 0x19e   : > { %1861 = vmatpush1.bf16.msk.msra.mxu1 %vm5006_vm15, %v4653_v2  ;;  %1258 = vmatmul.mubr.bf16.vlgmr.msra.gmra.mrb[4].mxu0 %v814_v34 }
 0x1a1   : > { %1299 = vmatmul.mubr.bf16.vlgmr.msra.gmra.mrb[4].mxu1 %v814_v34 }
 0x251   : > { %v1177_v39 = vpop.f32.mrb[0].mxu0 }
 0x252   : > { %v1357_v47 = vmul.f32 %v1320_v59, %v1177_v39  ;;  %v1179_v48 = vpop.f32.mrb[1].mxu0 }
 0x253   : > { %v1358_v2 = vmul.f32 %v1324_v32, %v1179_v48  ;;  %v1181_v5 = vpop.f32.mrb[2].mxu0 }
 0x254   : > { %1365 = vst [vmem:[%s4327_s17] sm:$0xff] %v1357_v47  ;;  %v1218_v7 = vpop.f32.mrb[0].mxu1  ;;  %v1182_v1 = vpop.f32.mrb[3].mxu0 }
 0x255   : > { %v1359_v3 = vmul.f32 %v1328_v41, %v1218_v7  ;;  %1366 = vst [vmem:[%s4327_s17 + $0x8] sm:$0xff] %v1358_v2  ;;  %v1220_v60 = vpop.f32.mrb[1].mxu1 }
 0x256   : > { %v1360_v14 = vmul.f32 %v1332_v63, %v1220_v60  ;;  %v1222_v6 = vpop.f32.mrb[2].mxu1 }
 0x257   : > { %1367 = vst [vmem:[%s4327_s17 + $0x10] sm:$0xff] %v1359_v3  ;;  %v1223_v8 = vpop.f32.mrb[3].mxu1 }
 0x258   : > { %1368 = vst [vmem:[%s4327_s17 + $0x18] sm:$0xff] %v1360_v14 }
 0x271   : > { %v1259_v25 = vpop.f32.mrb[4].mxu0 }
 0x272   : > { %v1361_v29 = vmul.f32 %v1336_v15, %v1259_v25  ;;  %v1261_v30 = vpop.f32.mrb[5].mxu0 }
 0x273   : > { %v1362_v36 = vmul.f32 %v1340_v20, %v1261_v30  ;;  %v1263_v43 = vpop.f32.mrb[6].mxu0 }
 0x274   : > { %1369 = vst [vmem:[%s4327_s17 + $0x20] sm:$0xff] %v1361_v29  ;;  %v1300_v44 = vpop.f32.mrb[4].mxu1  ;;  %v1264_v45 = vpop.f32.mrb[7].mxu0 }
 0x275   : > { %v1363_v46 = vmul.f32 %v1344_v27, %v1300_v44  ;;  %1370 = vst [vmem:[%s4327_s17 + $0x28] sm:$0xff] %v1362_v36  ;;  %v1302_v52 = vpop.f32.mrb[5].mxu1 }
 0x276   : > { %v1364_v53 = vmul.f32 %v1348_v35, %v1302_v52  ;;  %v1304_v55 = vpop.f32.mrb[6].mxu1 }
 0x277   : > { %1371 = vst [vmem:[%s4327_s17 + $0x30] sm:$0xff] %v1363_v46  ;;  %v1305_v56 = vpop.f32.mrb[7].mxu1 }
 0x278   : > { %1372 = vst [vmem:[%s4327_s17 + $0x38] sm:$0xff] %v1364_v53 }
 0x279   : > { %2030 = shalt.err (!%p2027_p10)
}
 0x27a   : > { %s2031_s6 = scalar_lea.hbm %s4344_s29, 1024  ;;  %s2035_s21 = scalar_lea.hbm %s4392_s2, 2048 }
 0x27b   : > { %p2032_p1 = scmp.ne.s32.totalorder %s4344_s29, %s2031_s6  ;;  %p2036_p3 = scmp.lt.u32.totalorder %s4344_s29, %s4392_s2 }
 0x27c   : > { %p2037_p11 = scmp.lt.u32.totalorder %s2035_s21, %s2031_s6  ;;  %p2039_p6 = scmp.lt.u32.totalorder %s2031_s6, %s4344_s29 }
 0x27d   : > { %p2033_p2 = pnand %p2032_p1, %p2201_p8 }
 0x27e   : > { %p2038_p4 = por %p2037_p11, %p2036_p3 }
 0x27f   : > { %p2034_p7 = pneg %p2033_p2 }
 0x280   : > { %p2040_p9 = por %p2039_p6, %p2038_p4 }
 0x282   : > { %p2041_p12 = pnand %p2040_p9, %p2034_p7 }
 0x284   : > { %2044 = shalt.err (!%p2041_p12)
}
 0x285   : > { %1906 = dma.vmem_to_hbm [thread:$0]  (%p2201_p8), %s4346_s24, 1024, %s4344_s29, %s1374_s13  }
 0x286 PF: > { %s1400_s23 = sand.u32 1, %s2075_s9   ;;  %p5008_p13 = scmp.ne.s32.totalorder %s4544_s16, 0 }
 0x287   : > { %p5009_p0 = scmp.ge.s32.totalorder %s2087_s12, 2  ;;  %s1401_s28 = scalar_lea.sflag [#allocation4], %s1400_s23 }
 0x289   : > { %p1917_p5 = pnand %p5009_p0, %p5008_p13 }
 0x28b   : > { %2070 = dma.done.wait (!%p1917_p5), %s1401_s28, 1024  }
 0x28c   : > { %2072 = vsyncadd (!%p1917_p5), %s1401_s28, 4294966272  ;;  %p16_p10 = scmp.ge.s32.totalorder %s2157_s20, 4   ;;  %s5010_s9 = smov %s2079_s10 }
 0x28d   : > { %s5011_s10 = smov %s2083_s11  ;;  %s5012_s11 = smov %s2193_s7 }
 0x28e   : > { %s5013_s12 = smov %s2157_s20  ;;  %18 = sbr.rel (!%p16_p10) target bundleno = 6 (0x6), region = 77 }
 0x295   :  { %1406 = vsyncpa [#allocation3], 1 }
 0x296   :  { %1408 = vsyncpa [#allocation3 + $0x1], 1 }
 0x297   :  { %1409 = vsyncpa [#allocation6], 1 }
 0x298   :  { %1410 = vsyncpa [#allocation4], 1 }
 0x299   :  { %1412 = vsyncpa [#allocation4 + $0x1], 1 }

</bundles_post_ra>
